<compile_context>
chip_gen: v7x
topology: tpu7x:2x2x1
jax: 0.10.0
libtpu: 0.0.40
codegen_flags: <defaults>
</compile_context>

<pallas_src>
import functools

import jax
import jax.numpy as jnp
from jax import lax
from jax.experimental import pallas as pl
from jax.experimental.pallas import tpu as pltpu


def _attention_kernel(x_ref, wq_ref, wk_ref, wv_ref, wo_ref, bo_ref, o_ref,
                      k_scr, v_scr, ctx_scr, *,
                      num_heads, seq_len, block_q, exact_softmax):
    """One (batch, q-tile) grid step.

    x_ref  : (1, N_pad, C)   full (padded) sequence for this batch element
    wq_ref : (H, C, hd)      per-head q weight, (in, out), softmax scale folded in
    wk_ref : (H, C, hd)      per-head k weight
    wv_ref : (H, C, hd)      per-head v weight
    wo_ref : (C, C)          output projection, (in, out)
    bo_ref : (1, C)          output projection bias
    o_ref  : (1, TQ, C)      output tile
    k_scr  : (H, N_pad, hd)  persistent K scratch (compute dtype)
    v_scr  : (H, N_pad, hd)  persistent V scratch (compute dtype)
    ctx_scr: (TQ, C)         concatenated head outputs for this tile (compute dtype)
    """
    qi = pl.program_id(1)
    cdt = x_ref.dtype                        # compute dtype (f32 or bf16); acc in f32
    n_pad = x_ref.shape[1]
    c = x_ref.shape[2]
    hd = c // num_heads

    # --- K/V projections: once per batch element, reused across all q-tiles. ---
    @pl.when(qi == 0)
    def _():
        x_seq = x_ref[0]                     # (N_pad, C)
        for h in range(num_heads):           # static h -> ref slices + static stores
            k_scr[h] = jnp.dot(x_seq, wk_ref[h],
                               preferred_element_type=jnp.float32).astype(cdt)
            v_scr[h] = jnp.dot(x_seq, wv_ref[h],
                               preferred_element_type=jnp.float32).astype(cdt)

    # --- Query rows for this tile, sliced from the resident sequence block. ---
    q_start = pl.multiple_of(qi * block_q, block_q)
    x_q = x_ref[0, pl.ds(q_start, block_q), :]                       # (TQ, C)

    # Key-padding mask (only materialized when padding exists; static decision).
    if n_pad > seq_len:
        key_valid = lax.broadcasted_iota(jnp.int32, (1, n_pad), 1) < seq_len
    else:
        key_valid = None

    # --- Per-head attention. Static Python loop, but all cross-iteration state
    # lives in VMEM scratch (no SSA accumulator chain); per-head operands are ref
    # slices starting at lane 0, head outputs land at their lane offset in ctx_scr.
    for h in range(num_heads):
        lo = h * hd
        q_h = jnp.dot(x_q, wq_ref[h],
                      preferred_element_type=jnp.float32).astype(cdt)        # (TQ, hd)
        s = lax.dot_general(q_h, k_scr[h], (((1,), (1,)), ((), ())),
                            preferred_element_type=jnp.float32)              # (TQ, N_pad)
        if key_valid is not None:
            s = jnp.where(key_valid, s, jnp.float32(-1e30))
        s = s - jnp.max(s, axis=-1, keepdims=True)
        p = jnp.exp(s)
        denom = jnp.sum(p, axis=-1, keepdims=True)
        if exact_softmax:
            p = p / denom
        else:
            p = p * pl.reciprocal(denom, approx=True)                        # EUP vrcp
        o_h = jnp.dot(p.astype(cdt), v_scr[h],
                      preferred_element_type=jnp.float32)                    # (TQ, hd)
        ctx_scr[:, lo:lo + hd] = o_h.astype(cdt)

    # --- One full-C-contraction output projection + bias (MXU-deep). ---
    out = jnp.dot(ctx_scr[...], wo_ref[...], preferred_element_type=jnp.float32)
    out = out + bo_ref[...].astype(jnp.float32)
    # TODO(synk): attn_drop / proj_drop are identity here (eval mode / p=0.0).
    o_ref[0] = out.astype(o_ref.dtype)


def prepare_attention_params(w_qkv, w_proj, b_proj, *, num_heads, qk_scale=None,
                             param_dtype=None):
    """One-time (init) parameter prep — keep out of the per-call hot path.

    w_qkv : (3C, C) PyTorch (out, in) layout, qkv_bias=False
    w_proj: (C, C)  PyTorch (out, in) layout
    b_proj: (C,)
    Returns head-major (in, out) weights:
      w_q, w_k, w_v : (H, C, hd)  with the softmax scale folded into w_q
      w_o           : (C, C)
      b_o           : (1, C)
    optionally cast to param_dtype (e.g. bf16 — recommended on v5e/v6e/v7x).
    """
    three_c, c = w_qkv.shape
    assert three_c == 3 * c and c % num_heads == 0
    hd = c // num_heads
    scale = qk_scale if qk_scale is not None else hd ** (-0.5)
    if param_dtype is not None:
        w_qkv = w_qkv.astype(param_dtype)
        w_proj = w_proj.astype(param_dtype)
        b_proj = b_proj.astype(param_dtype)
    wqkv_t = jnp.transpose(w_qkv)                                    # (C, 3C), (in, out)

    def to_head_major(w):                                            # (C, C) -> (H, C, hd)
        return jnp.transpose(w.reshape(c, num_heads, hd), (1, 0, 2))

    w_q = to_head_major(wqkv_t[:, :c] * jnp.asarray(scale, wqkv_t.dtype))
    w_k = to_head_major(wqkv_t[:, c:2 * c])
    w_v = to_head_major(wqkv_t[:, 2 * c:])
    w_o = jnp.transpose(w_proj)                                      # (C, C), (in, out)
    b_o = b_proj.reshape(1, c)
    return w_q, w_k, w_v, w_o, b_o


def attention_forward(x, params, *, num_heads, block_q=256, exact_softmax=False):
    """Pallas forward of vit.Attention. x: (B, N, C); params from prepare_attention_params."""
    w_q, w_k, w_v, w_o, b_o = params
    B, N, C = x.shape
    assert C % num_heads == 0
    hd = C // num_heads

    def round_up(a, b):
        return (a + b - 1) // b * b

    # q-tile size: multiple of 8 sublanes; pad N to a whole number of tiles so score
    # tiles stay (TQ, N_pad) and output stores are lane-dense. block_q=256 keeps the
    # v6e/v7x 2x256x256 MXU full on the projection / PV matmuls.
    assert block_q % 8 == 0
    tq = min(block_q, round_up(N, 8))
    n_pad = round_up(N, tq)
    nq = n_pad // tq

    x_p = x if n_pad == N else jnp.pad(x, ((0, 0), (0, n_pad - N), (0, 0)))
    cdt = x.dtype

    kernel = functools.partial(_attention_kernel, num_heads=num_heads, seq_len=N,
                               block_q=tq, exact_softmax=exact_softmax)

    # Weights/bias: whole-array resident in VMEM (no per-step DMA / double-buffering).
    weight_spec = pl.BlockSpec(memory_space=pltpu.MemorySpace.VMEM)

    # Explicit VMEM budget (default scoped limit is 16/32 MiB; v7x physical is 64 MiB).
    isz_x = jnp.dtype(cdt).itemsize
    isz_w = jnp.dtype(w_q.dtype).itemsize
    est = (2 * n_pad * C * isz_x            # x block, double-buffered
           + 2 * tq * C * isz_x             # output block, double-buffered
           + (4 * C * C + C) * isz_w        # resident weights + bias
           + 2 * n_pad * C * isz_x          # persistent K/V scratch
           + tq * C * isz_x                 # ctx scratch
           + 2 * tq * n_pad * 4)            # in-flight f32 score/prob tiles
    vmem_limit = int(min(max(est * 1.5, 32 * 1024 * 1024), 64 * 1024 * 1024))
    # TODO(synk): for very large N*C (footprint > ~64 MiB on v7x) add a KV grid axis
    # with a flash-style online softmax so residency becomes O(TQ * kv_tile), not O(N*C).
    # TODO(synk): if hd is not a multiple of 128, head-slab stores are masked; pad hd
    # to 128 lanes at init if the extra FLOPs are acceptable.

    out = pl.pallas_call(
        kernel,
        out_shape=jax.ShapeDtypeStruct((B, n_pad, C), cdt),
        grid_spec=pltpu.PrefetchScalarGridSpec(
            num_scalar_prefetch=0,
            grid=(B, nq),                   # B outermost (parallel), q-tiles innermost
            in_specs=[
                # Full (padded) sequence; constant index across qi -> fetched once per batch.
                pl.BlockSpec((1, n_pad, C), lambda b, qi: (b, 0, 0)),
                weight_spec,   # w_q (H, C, hd), scale folded
                weight_spec,   # w_k (H, C, hd)
                weight_spec,   # w_v (H, C, hd)
                weight_spec,   # w_o (C, C)
                weight_spec,   # b_o (1, C)
            ],
            out_specs=pl.BlockSpec((1, tq, C), lambda b, qi: (b, qi, 0)),
            scratch_shapes=[
                pltpu.VMEM((num_heads, n_pad, hd), cdt),   # K scratch (persists over qi)
                pltpu.VMEM((num_heads, n_pad, hd), cdt),   # V scratch (persists over qi)
                pltpu.VMEM((tq, C), cdt),                  # concatenated head outputs
            ],
        ),
        compiler_params=pltpu.CompilerParams(
            # qi must be "arbitrary": K/V scratch is filled at qi==0 and reused. B is the
            # megacore axis (for B=1 on v7x, consider splitting heads/batch for 2 TCs).
            dimension_semantics=("parallel", "arbitrary"),
            vmem_limit_bytes=vmem_limit,
        ),
    )(x_p, w_q, w_k, w_v, w_o, b_o)

    return out if n_pad == N else out[:, :N, :]


def _reference(x, w_qkv, w_proj, b_proj, *, num_heads):
    """Pure-JAX re-implementation of the PyTorch forward, for checking."""
    B, N, C = x.shape
    hd = C // num_heads
    scale = hd ** (-0.5)
    qkv = x @ w_qkv.T                                      # (B, N, 3C)
    qkv = qkv.reshape(B, N, 3, num_heads, hd)
    qkv = jnp.transpose(qkv, (2, 0, 3, 1, 4))              # (3, B, H, N, hd)
    q, k, v = qkv[0], qkv[1], qkv[2]
    attn = jnp.einsum("bhnd,bhmd->bhnm", q, k) * scale
    attn = jax.nn.softmax(attn, axis=-1)
    out = jnp.einsum("bhnm,bhmd->bhnd", attn, v)
    out = jnp.transpose(out, (0, 2, 1, 3)).reshape(B, N, C)
    return out @ w_proj.T + b_proj


if __name__ == "__main__":
    root = jax.random.PRNGKey(0)
    k1, k2, k3 = jax.random.split(root, 3)

    def make_inputs(key, B, N, C):
        kx, kq, kp, kb = jax.random.split(key, 4)
        x = jax.random.normal(kx, (B, N, C), dtype=jnp.float32)
        w_qkv = 0.1 * jax.random.normal(kq, (3 * C, C), dtype=jnp.float32)
        w_proj = 0.1 * jax.random.normal(kp, (C, C), dtype=jnp.float32)
        b_proj = 0.01 * jax.random.normal(kb, (C,), dtype=jnp.float32)
        return x, w_qkv, w_proj, b_proj

    # Case 1: small shapes matching the module defaults (f32, single q tile, exact softmax).
    B, N, C, H = 2, 8, 32, 8
    x, w_qkv, w_proj, b_proj = make_inputs(k1, B, N, C)
    params = prepare_attention_params(w_qkv, w_proj, b_proj, num_heads=H)
    out = jax.block_until_ready(
        attention_forward(x, params, num_heads=H, exact_softmax=True))
    ref = _reference(x, w_qkv, w_proj, b_proj, num_heads=H)
    assert out.shape == (B, N, C)
    assert jnp.allclose(out, ref, atol=1e-2, rtol=1e-2), "f32 small-case mismatch"

    # Case 2: aligned shapes, two q-tiles -> exercises K/V-scratch reuse across qi.
    B2, N2, C2, H2 = 2, 256, 256, 8
    x2, w_qkv2, w_proj2, b_proj2 = make_inputs(k2, B2, N2, C2)
    params2 = prepare_attention_params(w_qkv2, w_proj2, b_proj2, num_heads=H2)
    out2 = jax.block_until_ready(
        attention_forward(x2, params2, num_heads=H2, block_q=128))
    ref2 = _reference(x2, w_qkv2, w_proj2, b_proj2, num_heads=H2)
    assert jnp.allclose(out2, ref2, atol=1e-2, rtol=1e-2), "f32 tiled-case mismatch"

    # Case 3: ViT-like ragged N (197) -> exercises N padding + key masking.
    B3, N3, C3, H3 = 2, 197, 256, 8
    x3, w_qkv3, w_proj3, b_proj3 = make_inputs(k3, B3, N3, C3)
    params3 = prepare_attention_params(w_qkv3, w_proj3, b_proj3, num_heads=H3)
    out3 = jax.block_until_ready(
        attention_forward(x3, params3, num_heads=H3, block_q=128))
    ref3 = _reference(x3, w_qkv3, w_proj3, b_proj3, num_heads=H3)
    assert out3.shape == (B3, N3, C3)
    assert jnp.allclose(out3, ref3, atol=1e-2, rtol=1e-2), "ragged-N case mismatch"

    # Case 4: bf16 operands (MXU-native path) with f32 accumulation inside the kernel.
    params4 = prepare_attention_params(w_qkv2, w_proj2, b_proj2, num_heads=H2,
                                       param_dtype=jnp.bfloat16)
    out4 = jax.block_until_ready(
        attention_forward(x2.astype(jnp.bfloat16), params4, num_heads=H2, block_q=128))
    assert out4.dtype == jnp.bfloat16
    out4_f32 = out4.astype(jnp.float32)
    assert bool(jnp.all(jnp.isfinite(out4_f32)))
    assert jnp.allclose(out4_f32, ref2, atol=1e-1, rtol=1e-1), "bf16 case mismatch"

    print("KERNEL_OK")
</pallas_src>

<mosaic_0001>
module attributes {stable_mosaic.version = 11 : i64} {
  func.func @_attention_kernel(%arg0: i32, %arg1: i32, %arg2: memref<1x8x32xf32, #tpu.memory_space<vmem>>, %arg3: memref<8x32x4xf32, #tpu.memory_space<vmem>>, %arg4: memref<8x32x4xf32, #tpu.memory_space<vmem>>, %arg5: memref<8x32x4xf32, #tpu.memory_space<vmem>>, %arg6: memref<32x32xf32, #tpu.memory_space<vmem>>, %arg7: memref<1x32xf32, #tpu.memory_space<vmem>>, %arg8: memref<1x8x32xf32, #tpu.memory_space<vmem>>, %arg9: memref<8x8x4xf32, #tpu.memory_space<vmem>>, %arg10: memref<8x8x4xf32, #tpu.memory_space<vmem>>, %arg11: memref<8x32xf32, #tpu.memory_space<vmem>>) attributes {dimension_semantics = [#tpu.dimension_semantics<parallel>, #tpu.dimension_semantics<arbitrary>], iteration_bounds = array<i64: 2, 1>, scalar_prefetch = 0 : i64, scratch_operands = 3 : i64, tpu.core_type = #tpu.core_type<tc>, window_params = [{transform_indices = @transform_0, window_bounds = array<i64: 1, 8, 32>}, {pipeline_mode = #tpu.pipeline_mode<synchronous>, transform_indices = @transform_1, window_bounds = array<i64: 8, 32, 4>}, {pipeline_mode = #tpu.pipeline_mode<synchronous>, transform_indices = @transform_2, window_bounds = array<i64: 8, 32, 4>}, {pipeline_mode = #tpu.pipeline_mode<synchronous>, transform_indices = @transform_3, window_bounds = array<i64: 8, 32, 4>}, {pipeline_mode = #tpu.pipeline_mode<synchronous>, transform_indices = @transform_4, window_bounds = array<i64: 32, 32>}, {pipeline_mode = #tpu.pipeline_mode<synchronous>, transform_indices = @transform_5, window_bounds = array<i64: 1, 32>}, {transform_indices = @transform_6, window_bounds = array<i64: 1, 8, 32>}]} {
    %c0_i32 = arith.constant 0 : i32
    %0 = arith.cmpi eq, %arg1, %c0_i32 : i32
    %1 = arith.extui %0 : i1 to i32
    %c0_i32_0 = arith.constant 0 : i32
    %2 = arith.cmpi ne, %1, %c0_i32_0 : i32
    scf.if %2 {
      %c0_126 = arith.constant 0 : index
      %c0_127 = arith.constant 0 : index
      %c0_128 = arith.constant 0 : index
      %169 = vector.load %arg2[%c0_126, %c0_127, %c0_128] : memref<1x8x32xf32, #tpu.memory_space<vmem>>, vector<1x8x32xf32>
      %170 = vector.shape_cast %169 : vector<1x8x32xf32> to vector<8x32xf32>
      %c0_129 = arith.constant 0 : index
      %c0_130 = arith.constant 0 : index
      %c0_131 = arith.constant 0 : index
      %171 = vector.load %arg4[%c0_129, %c0_130, %c0_131] : memref<8x32x4xf32, #tpu.memory_space<vmem>>, vector<1x32x4xf32>
      %172 = vector.shape_cast %171 : vector<1x32x4xf32> to vector<32x4xf32>
      %cst_132 = arith.constant dense<0.000000e+00> : vector<8x4xf32>
      %173 = tpu.matmul %170, %172, %cst_132 {dimension_numbers = #tpu.dot_dimension_numbers<[1], [0], [0], [1], [0, 0, 1, 1], [], []>} : vector<8x32xf32>, vector<32x4xf32>, vector<8x4xf32> -> vector<8x4xf32>
      %c0_133 = arith.constant 0 : index
      %c0_134 = arith.constant 0 : index
      %c0_135 = arith.constant 0 : index
      %174 = vector.load %arg9[%c0_133, %c0_134, %c0_135] : memref<8x8x4xf32, #tpu.memory_space<vmem>>, vector<1x8x4xf32>
      %175 = vector.shape_cast %174 : vector<1x8x4xf32> to vector<8x4xf32>
      %176 = vector.shape_cast %173 : vector<8x4xf32> to vector<1x8x4xf32>
      tpu.vector_store %arg9[%c0_133, %c0_134, %c0_135], %176 {strides = array<i32>} : memref<8x8x4xf32, #tpu.memory_space<vmem>>, vector<1x8x4xf32>,
      %c0_136 = arith.constant 0 : index
      %c0_137 = arith.constant 0 : index
      %c0_138 = arith.constant 0 : index
      %177 = vector.load %arg5[%c0_136, %c0_137, %c0_138] : memref<8x32x4xf32, #tpu.memory_space<vmem>>, vector<1x32x4xf32>
      %178 = vector.shape_cast %177 : vector<1x32x4xf32> to vector<32x4xf32>
      %cst_139 = arith.constant dense<0.000000e+00> : vector<8x4xf32>
      %179 = tpu.matmul %170, %178, %cst_139 {dimension_numbers = #tpu.dot_dimension_numbers<[1], [0], [0], [1], [0, 0, 1, 1], [], []>} : vector<8x32xf32>, vector<32x4xf32>, vector<8x4xf32> -> vector<8x4xf32>
      %c0_140 = arith.constant 0 : index
      %c0_141 = arith.constant 0 : index
      %c0_142 = arith.constant 0 : index
      %180 = vector.load %arg10[%c0_140, %c0_141, %c0_142] : memref<8x8x4xf32, #tpu.memory_space<vmem>>, vector<1x8x4xf32>
      %181 = vector.shape_cast %180 : vector<1x8x4xf32> to vector<8x4xf32>
      %182 = vector.shape_cast %179 : vector<8x4xf32> to vector<1x8x4xf32>
      tpu.vector_store %arg10[%c0_140, %c0_141, %c0_142], %182 {strides = array<i32>} : memref<8x8x4xf32, #tpu.memory_space<vmem>>, vector<1x8x4xf32>,
      %c1_143 = arith.constant 1 : index
      %c0_144 = arith.constant 0 : index
      %c0_145 = arith.constant 0 : index
      %183 = vector.load %arg4[%c1_143, %c0_144, %c0_145] : memref<8x32x4xf32, #tpu.memory_space<vmem>>, vector<1x32x4xf32>
      %184 = vector.shape_cast %183 : vector<1x32x4xf32> to vector<32x4xf32>
      %cst_146 = arith.constant dense<0.000000e+00> : vector<8x4xf32>
      %185 = tpu.matmul %170, %184, %cst_146 {dimension_numbers = #tpu.dot_dimension_numbers<[1], [0], [0], [1], [0, 0, 1, 1], [], []>} : vector<8x32xf32>, vector<32x4xf32>, vector<8x4xf32> -> vector<8x4xf32>
      %c1_147 = arith.constant 1 : index
      %c0_148 = arith.constant 0 : index
      %c0_149 = arith.constant 0 : index
      %186 = vector.load %arg9[%c1_147, %c0_148, %c0_149] : memref<8x8x4xf32, #tpu.memory_space<vmem>>, vector<1x8x4xf32>
      %187 = vector.shape_cast %186 : vector<1x8x4xf32> to vector<8x4xf32>
      %188 = vector.shape_cast %185 : vector<8x4xf32> to vector<1x8x4xf32>
      tpu.vector_store %arg9[%c1_147, %c0_148, %c0_149], %188 {strides = array<i32>} : memref<8x8x4xf32, #tpu.memory_space<vmem>>, vector<1x8x4xf32>,
      %c1_150 = arith.constant 1 : index
      %c0_151 = arith.constant 0 : index
      %c0_152 = arith.constant 0 : index
      %189 = vector.load %arg5[%c1_150, %c0_151, %c0_152] : memref<8x32x4xf32, #tpu.memory_space<vmem>>, vector<1x32x4xf32>
      %190 = vector.shape_cast %189 : vector<1x32x4xf32> to vector<32x4xf32>
      %cst_153 = arith.constant dense<0.000000e+00> : vector<8x4xf32>
      %191 = tpu.matmul %170, %190, %cst_153 {dimension_numbers = #tpu.dot_dimension_numbers<[1], [0], [0], [1], [0, 0, 1, 1], [], []>} : vector<8x32xf32>, vector<32x4xf32>, vector<8x4xf32> -> vector<8x4xf32>
      %c1_154 = arith.constant 1 : index
      %c0_155 = arith.constant 0 : index
      %c0_156 = arith.constant 0 : index
      %192 = vector.load %arg10[%c1_154, %c0_155, %c0_156] : memref<8x8x4xf32, #tpu.memory_space<vmem>>, vector<1x8x4xf32>
      %193 = vector.shape_cast %192 : vector<1x8x4xf32> to vector<8x4xf32>
      %194 = vector.shape_cast %191 : vector<8x4xf32> to vector<1x8x4xf32>
      tpu.vector_store %arg10[%c1_154, %c0_155, %c0_156], %194 {strides = array<i32>} : memref<8x8x4xf32, #tpu.memory_space<vmem>>, vector<1x8x4xf32>,
      %c2_157 = arith.constant 2 : index
      %c0_158 = arith.constant 0 : index
      %c0_159 = arith.constant 0 : index
      %195 = vector.load %arg4[%c2_157, %c0_158, %c0_159] : memref<8x32x4xf32, #tpu.memory_space<vmem>>, vector<1x32x4xf32>
      %196 = vector.shape_cast %195 : vector<1x32x4xf32> to vector<32x4xf32>
      %cst_160 = arith.constant dense<0.000000e+00> : vector<8x4xf32>
      %197 = tpu.matmul %170, %196, %cst_160 {dimension_numbers = #tpu.dot_dimension_numbers<[1], [0], [0], [1], [0, 0, 1, 1], [], []>} : vector<8x32xf32>, vector<32x4xf32>, vector<8x4xf32> -> vector<8x4xf32>
      %c2_161 = arith.constant 2 : index
      %c0_162 = arith.constant 0 : index
      %c0_163 = arith.constant 0 : index
      %198 = vector.load %arg9[%c2_161, %c0_162, %c0_163] : memref<8x8x4xf32, #tpu.memory_space<vmem>>, vector<1x8x4xf32>
      %199 = vector.shape_cast %198 : vector<1x8x4xf32> to vector<8x4xf32>
      %200 = vector.shape_cast %197 : vector<8x4xf32> to vector<1x8x4xf32>
      tpu.vector_store %arg9[%c2_161, %c0_162, %c0_163], %200 {strides = array<i32>} : memref<8x8x4xf32, #tpu.memory_space<vmem>>, vector<1x8x4xf32>,
      %c2_164 = arith.constant 2 : index
      %c0_165 = arith.constant 0 : index
      %c0_166 = arith.constant 0 : index
      %201 = vector.load %arg5[%c2_164, %c0_165, %c0_166] : memref<8x32x4xf32, #tpu.memory_space<vmem>>, vector<1x32x4xf32>
      %202 = vector.shape_cast %201 : vector<1x32x4xf32> to vector<32x4xf32>
      %cst_167 = arith.constant dense<0.000000e+00> : vector<8x4xf32>
      %203 = tpu.matmul %170, %202, %cst_167 {dimension_numbers = #tpu.dot_dimension_numbers<[1], [0], [0], [1], [0, 0, 1, 1], [], []>} : vector<8x32xf32>, vector<32x4xf32>, vector<8x4xf32> -> vector<8x4xf32>
      %c2_168 = arith.constant 2 : index
      %c0_169 = arith.constant 0 : index
      %c0_170 = arith.constant 0 : index
      %204 = vector.load %arg10[%c2_168, %c0_169, %c0_170] : memref<8x8x4xf32, #tpu.memory_space<vmem>>, vector<1x8x4xf32>
      %205 = vector.shape_cast %204 : vector<1x8x4xf32> to vector<8x4xf32>
      %206 = vector.shape_cast %203 : vector<8x4xf32> to vector<1x8x4xf32>
      tpu.vector_store %arg10[%c2_168, %c0_169, %c0_170], %206 {strides = array<i32>} : memref<8x8x4xf32, #tpu.memory_space<vmem>>, vector<1x8x4xf32>,
      %c3_171 = arith.constant 3 : index
      %c0_172 = arith.constant 0 : index
      %c0_173 = arith.constant 0 : index
      %207 = vector.load %arg4[%c3_171, %c0_172, %c0_173] : memref<8x32x4xf32, #tpu.memory_space<vmem>>, vector<1x32x4xf32>
      %208 = vector.shape_cast %207 : vector<1x32x4xf32> to vector<32x4xf32>
      %cst_174 = arith.constant dense<0.000000e+00> : vector<8x4xf32>
      %209 = tpu.matmul %170, %208, %cst_174 {dimension_numbers = #tpu.dot_dimension_numbers<[1], [0], [0], [1], [0, 0, 1, 1], [], []>} : vector<8x32xf32>, vector<32x4xf32>, vector<8x4xf32> -> vector<8x4xf32>
      %c3_175 = arith.constant 3 : index
      %c0_176 = arith.constant 0 : index
      %c0_177 = arith.constant 0 : index
      %210 = vector.load %arg9[%c3_175, %c0_176, %c0_177] : memref<8x8x4xf32, #tpu.memory_space<vmem>>, vector<1x8x4xf32>
      %211 = vector.shape_cast %210 : vector<1x8x4xf32> to vector<8x4xf32>
      %212 = vector.shape_cast %209 : vector<8x4xf32> to vector<1x8x4xf32>
      tpu.vector_store %arg9[%c3_175, %c0_176, %c0_177], %212 {strides = array<i32>} : memref<8x8x4xf32, #tpu.memory_space<vmem>>, vector<1x8x4xf32>,
      %c3_178 = arith.constant 3 : index
      %c0_179 = arith.constant 0 : index
      %c0_180 = arith.constant 0 : index
      %213 = vector.load %arg5[%c3_178, %c0_179, %c0_180] : memref<8x32x4xf32, #tpu.memory_space<vmem>>, vector<1x32x4xf32>
      %214 = vector.shape_cast %213 : vector<1x32x4xf32> to vector<32x4xf32>
      %cst_181 = arith.constant dense<0.000000e+00> : vector<8x4xf32>
      %215 = tpu.matmul %170, %214, %cst_181 {dimension_numbers = #tpu.dot_dimension_numbers<[1], [0], [0], [1], [0, 0, 1, 1], [], []>} : vector<8x32xf32>, vector<32x4xf32>, vector<8x4xf32> -> vector<8x4xf32>
      %c3_182 = arith.constant 3 : index
      %c0_183 = arith.constant 0 : index
      %c0_184 = arith.constant 0 : index
      %216 = vector.load %arg10[%c3_182, %c0_183, %c0_184] : memref<8x8x4xf32, #tpu.memory_space<vmem>>, vector<1x8x4xf32>
      %217 = vector.shape_cast %216 : vector<1x8x4xf32> to vector<8x4xf32>
      %218 = vector.shape_cast %215 : vector<8x4xf32> to vector<1x8x4xf32>
      tpu.vector_store %arg10[%c3_182, %c0_183, %c0_184], %218 {strides = array<i32>} : memref<8x8x4xf32, #tpu.memory_space<vmem>>, vector<1x8x4xf32>,
      %c4_185 = arith.constant 4 : index
      %c0_186 = arith.constant 0 : index
      %c0_187 = arith.constant 0 : index
      %219 = vector.load %arg4[%c4_185, %c0_186, %c0_187] : memref<8x32x4xf32, #tpu.memory_space<vmem>>, vector<1x32x4xf32>
      %220 = vector.shape_cast %219 : vector<1x32x4xf32> to vector<32x4xf32>
      %cst_188 = arith.constant dense<0.000000e+00> : vector<8x4xf32>
      %221 = tpu.matmul %170, %220, %cst_188 {dimension_numbers = #tpu.dot_dimension_numbers<[1], [0], [0], [1], [0, 0, 1, 1], [], []>} : vector<8x32xf32>, vector<32x4xf32>, vector<8x4xf32> -> vector<8x4xf32>
      %c4_189 = arith.constant 4 : index
      %c0_190 = arith.constant 0 : index
      %c0_191 = arith.constant 0 : index
      %222 = vector.load %arg9[%c4_189, %c0_190, %c0_191] : memref<8x8x4xf32, #tpu.memory_space<vmem>>, vector<1x8x4xf32>
      %223 = vector.shape_cast %222 : vector<1x8x4xf32> to vector<8x4xf32>
      %224 = vector.shape_cast %221 : vector<8x4xf32> to vector<1x8x4xf32>
      tpu.vector_store %arg9[%c4_189, %c0_190, %c0_191], %224 {strides = array<i32>} : memref<8x8x4xf32, #tpu.memory_space<vmem>>, vector<1x8x4xf32>,
      %c4_192 = arith.constant 4 : index
      %c0_193 = arith.constant 0 : index
      %c0_194 = arith.constant 0 : index
      %225 = vector.load %arg5[%c4_192, %c0_193, %c0_194] : memref<8x32x4xf32, #tpu.memory_space<vmem>>, vector<1x32x4xf32>
      %226 = vector.shape_cast %225 : vector<1x32x4xf32> to vector<32x4xf32>
      %cst_195 = arith.constant dense<0.000000e+00> : vector<8x4xf32>
      %227 = tpu.matmul %170, %226, %cst_195 {dimension_numbers = #tpu.dot_dimension_numbers<[1], [0], [0], [1], [0, 0, 1, 1], [], []>} : vector<8x32xf32>, vector<32x4xf32>, vector<8x4xf32> -> vector<8x4xf32>
      %c4_196 = arith.constant 4 : index
      %c0_197 = arith.constant 0 : index
      %c0_198 = arith.constant 0 : index
      %228 = vector.load %arg10[%c4_196, %c0_197, %c0_198] : memref<8x8x4xf32, #tpu.memory_space<vmem>>, vector<1x8x4xf32>
      %229 = vector.shape_cast %228 : vector<1x8x4xf32> to vector<8x4xf32>
      %230 = vector.shape_cast %227 : vector<8x4xf32> to vector<1x8x4xf32>
      tpu.vector_store %arg10[%c4_196, %c0_197, %c0_198], %230 {strides = array<i32>} : memref<8x8x4xf32, #tpu.memory_space<vmem>>, vector<1x8x4xf32>,
      %c5_199 = arith.constant 5 : index
      %c0_200 = arith.constant 0 : index
      %c0_201 = arith.constant 0 : index
      %231 = vector.load %arg4[%c5_199, %c0_200, %c0_201] : memref<8x32x4xf32, #tpu.memory_space<vmem>>, vector<1x32x4xf32>
      %232 = vector.shape_cast %231 : vector<1x32x4xf32> to vector<32x4xf32>
      %cst_202 = arith.constant dense<0.000000e+00> : vector<8x4xf32>
      %233 = tpu.matmul %170, %232, %cst_202 {dimension_numbers = #tpu.dot_dimension_numbers<[1], [0], [0], [1], [0, 0, 1, 1], [], []>} : vector<8x32xf32>, vector<32x4xf32>, vector<8x4xf32> -> vector<8x4xf32>
      %c5_203 = arith.constant 5 : index
      %c0_204 = arith.constant 0 : index
      %c0_205 = arith.constant 0 : index
      %234 = vector.load %arg9[%c5_203, %c0_204, %c0_205] : memref<8x8x4xf32, #tpu.memory_space<vmem>>, vector<1x8x4xf32>
      %235 = vector.shape_cast %234 : vector<1x8x4xf32> to vector<8x4xf32>
      %236 = vector.shape_cast %233 : vector<8x4xf32> to vector<1x8x4xf32>
      tpu.vector_store %arg9[%c5_203, %c0_204, %c0_205], %236 {strides = array<i32>} : memref<8x8x4xf32, #tpu.memory_space<vmem>>, vector<1x8x4xf32>,
      %c5_206 = arith.constant 5 : index
      %c0_207 = arith.constant 0 : index
      %c0_208 = arith.constant 0 : index
      %237 = vector.load %arg5[%c5_206, %c0_207, %c0_208] : memref<8x32x4xf32, #tpu.memory_space<vmem>>, vector<1x32x4xf32>
      %238 = vector.shape_cast %237 : vector<1x32x4xf32> to vector<32x4xf32>
      %cst_209 = arith.constant dense<0.000000e+00> : vector<8x4xf32>
      %239 = tpu.matmul %170, %238, %cst_209 {dimension_numbers = #tpu.dot_dimension_numbers<[1], [0], [0], [1], [0, 0, 1, 1], [], []>} : vector<8x32xf32>, vector<32x4xf32>, vector<8x4xf32> -> vector<8x4xf32>
      %c5_210 = arith.constant 5 : index
      %c0_211 = arith.constant 0 : index
      %c0_212 = arith.constant 0 : index
      %240 = vector.load %arg10[%c5_210, %c0_211, %c0_212] : memref<8x8x4xf32, #tpu.memory_space<vmem>>, vector<1x8x4xf32>
      %241 = vector.shape_cast %240 : vector<1x8x4xf32> to vector<8x4xf32>
      %242 = vector.shape_cast %239 : vector<8x4xf32> to vector<1x8x4xf32>
      tpu.vector_store %arg10[%c5_210, %c0_211, %c0_212], %242 {strides = array<i32>} : memref<8x8x4xf32, #tpu.memory_space<vmem>>, vector<1x8x4xf32>,
      %c6_213 = arith.constant 6 : index
      %c0_214 = arith.constant 0 : index
      %c0_215 = arith.constant 0 : index
      %243 = vector.load %arg4[%c6_213, %c0_214, %c0_215] : memref<8x32x4xf32, #tpu.memory_space<vmem>>, vector<1x32x4xf32>
      %244 = vector.shape_cast %243 : vector<1x32x4xf32> to vector<32x4xf32>
      %cst_216 = arith.constant dense<0.000000e+00> : vector<8x4xf32>
      %245 = tpu.matmul %170, %244, %cst_216 {dimension_numbers = #tpu.dot_dimension_numbers<[1], [0], [0], [1], [0, 0, 1, 1], [], []>} : vector<8x32xf32>, vector<32x4xf32>, vector<8x4xf32> -> vector<8x4xf32>
      %c6_217 = arith.constant 6 : index
      %c0_218 = arith.constant 0 : index
      %c0_219 = arith.constant 0 : index
      %246 = vector.load %arg9[%c6_217, %c0_218, %c0_219] : memref<8x8x4xf32, #tpu.memory_space<vmem>>, vector<1x8x4xf32>
      %247 = vector.shape_cast %246 : vector<1x8x4xf32> to vector<8x4xf32>
      %248 = vector.shape_cast %245 : vector<8x4xf32> to vector<1x8x4xf32>
      tpu.vector_store %arg9[%c6_217, %c0_218, %c0_219], %248 {strides = array<i32>} : memref<8x8x4xf32, #tpu.memory_space<vmem>>, vector<1x8x4xf32>,
      %c6_220 = arith.constant 6 : index
      %c0_221 = arith.constant 0 : index
      %c0_222 = arith.constant 0 : index
      %249 = vector.load %arg5[%c6_220, %c0_221, %c0_222] : memref<8x32x4xf32, #tpu.memory_space<vmem>>, vector<1x32x4xf32>
      %250 = vector.shape_cast %249 : vector<1x32x4xf32> to vector<32x4xf32>
      %cst_223 = arith.constant dense<0.000000e+00> : vector<8x4xf32>
      %251 = tpu.matmul %170, %250, %cst_223 {dimension_numbers = #tpu.dot_dimension_numbers<[1], [0], [0], [1], [0, 0, 1, 1], [], []>} : vector<8x32xf32>, vector<32x4xf32>, vector<8x4xf32> -> vector<8x4xf32>
      %c6_224 = arith.constant 6 : index
      %c0_225 = arith.constant 0 : index
      %c0_226 = arith.constant 0 : index
      %252 = vector.load %arg10[%c6_224, %c0_225, %c0_226] : memref<8x8x4xf32, #tpu.memory_space<vmem>>, vector<1x8x4xf32>
      %253 = vector.shape_cast %252 : vector<1x8x4xf32> to vector<8x4xf32>
      %254 = vector.shape_cast %251 : vector<8x4xf32> to vector<1x8x4xf32>
      tpu.vector_store %arg10[%c6_224, %c0_225, %c0_226], %254 {strides = array<i32>} : memref<8x8x4xf32, #tpu.memory_space<vmem>>, vector<1x8x4xf32>,
      %c7_227 = arith.constant 7 : index
      %c0_228 = arith.constant 0 : index
      %c0_229 = arith.constant 0 : index
      %255 = vector.load %arg4[%c7_227, %c0_228, %c0_229] : memref<8x32x4xf32, #tpu.memory_space<vmem>>, vector<1x32x4xf32>
      %256 = vector.shape_cast %255 : vector<1x32x4xf32> to vector<32x4xf32>
      %cst_230 = arith.constant dense<0.000000e+00> : vector<8x4xf32>
      %257 = tpu.matmul %170, %256, %cst_230 {dimension_numbers = #tpu.dot_dimension_numbers<[1], [0], [0], [1], [0, 0, 1, 1], [], []>} : vector<8x32xf32>, vector<32x4xf32>, vector<8x4xf32> -> vector<8x4xf32>
      %c7_231 = arith.constant 7 : index
      %c0_232 = arith.constant 0 : index
      %c0_233 = arith.constant 0 : index
      %258 = vector.load %arg9[%c7_231, %c0_232, %c0_233] : memref<8x8x4xf32, #tpu.memory_space<vmem>>, vector<1x8x4xf32>
      %259 = vector.shape_cast %258 : vector<1x8x4xf32> to vector<8x4xf32>
      %260 = vector.shape_cast %257 : vector<8x4xf32> to vector<1x8x4xf32>
      tpu.vector_store %arg9[%c7_231, %c0_232, %c0_233], %260 {strides = array<i32>} : memref<8x8x4xf32, #tpu.memory_space<vmem>>, vector<1x8x4xf32>,
      %c7_234 = arith.constant 7 : index
      %c0_235 = arith.constant 0 : index
      %c0_236 = arith.constant 0 : index
      %261 = vector.load %arg5[%c7_234, %c0_235, %c0_236] : memref<8x32x4xf32, #tpu.memory_space<vmem>>, vector<1x32x4xf32>
      %262 = vector.shape_cast %261 : vector<1x32x4xf32> to vector<32x4xf32>
      %cst_237 = arith.constant dense<0.000000e+00> : vector<8x4xf32>
      %263 = tpu.matmul %170, %262, %cst_237 {dimension_numbers = #tpu.dot_dimension_numbers<[1], [0], [0], [1], [0, 0, 1, 1], [], []>} : vector<8x32xf32>, vector<32x4xf32>, vector<8x4xf32> -> vector<8x4xf32>
      %c7_238 = arith.constant 7 : index
      %c0_239 = arith.constant 0 : index
      %c0_240 = arith.constant 0 : index
      %264 = vector.load %arg10[%c7_238, %c0_239, %c0_240] : memref<8x8x4xf32, #tpu.memory_space<vmem>>, vector<1x8x4xf32>
      %265 = vector.shape_cast %264 : vector<1x8x4xf32> to vector<8x4xf32>
      %266 = vector.shape_cast %263 : vector<8x4xf32> to vector<1x8x4xf32>
      tpu.vector_store %arg10[%c7_238, %c0_239, %c0_240], %266 {strides = array<i32>} : memref<8x8x4xf32, #tpu.memory_space<vmem>>, vector<1x8x4xf32>,
    } else {
    }
    %c8_i32 = arith.constant 8 : i32
    %3 = arith.muli %arg1, %c8_i32 : i32
    %4 = tpu.assume_multiple %3, 8 : i32
    %c0 = arith.constant 0 : index
    %5 = arith.index_cast %4 : i32 to index
    %c0_1 = arith.constant 0 : index
    %6 = vector.load %arg2[%c0, %5, %c0_1] : memref<1x8x32xf32, #tpu.memory_space<vmem>>, vector<1x8x32xf32>
    %7 = vector.shape_cast %6 : vector<1x8x32xf32> to vector<8x32xf32>
    %c0_2 = arith.constant 0 : index
    %c0_3 = arith.constant 0 : index
    %c0_4 = arith.constant 0 : index
    %8 = vector.load %arg3[%c0_2, %c0_3, %c0_4] : memref<8x32x4xf32, #tpu.memory_space<vmem>>, vector<1x32x4xf32>
    %9 = vector.shape_cast %8 : vector<1x32x4xf32> to vector<32x4xf32>
    %cst = arith.constant dense<0.000000e+00> : vector<8x4xf32>
    %10 = tpu.matmul %7, %9, %cst {dimension_numbers = #tpu.dot_dimension_numbers<[1], [0], [0], [1], [0, 0, 1, 1], [], []>} : vector<8x32xf32>, vector<32x4xf32>, vector<8x4xf32> -> vector<8x4xf32>
    %c0_5 = arith.constant 0 : index
    %c0_6 = arith.constant 0 : index
    %c0_7 = arith.constant 0 : index
    %11 = vector.load %arg9[%c0_5, %c0_6, %c0_7] : memref<8x8x4xf32, #tpu.memory_space<vmem>>, vector<1x8x4xf32>
    %12 = vector.shape_cast %11 : vector<1x8x4xf32> to vector<8x4xf32>
    %cst_8 = arith.constant dense<0.000000e+00> : vector<8x8xf32>
    %13 = tpu.matmul %10, %12, %cst_8 {dimension_numbers = #tpu.dot_dimension_numbers<[1], [1], [0], [0], [0, 0, 1, 0], [], []>} : vector<8x4xf32>, vector<8x4xf32>, vector<8x8xf32> -> vector<8x8xf32>
    %cst_9 = arith.constant dense<0xFF800000> : vector<8xf32>
    %14 = vector.multi_reduction <maximumf>, %13, %cst_9 [1] : vector<8x8xf32> to vector<8xf32>
    %15 = vector.shape_cast %14 : vector<8xf32> to vector<8x1xf32>
    %16 = vector.broadcast %15 : vector<8x1xf32> to vector<8x8xf32>
    %17 = arith.subf %13, %16 : vector<8x8xf32>
    %18 = math.exp %17 : vector<8x8xf32>
    %cst_10 = arith.constant dense<0.000000e+00> : vector<8xf32>
    %19 = vector.multi_reduction <add>, %18, %cst_10 [1] : vector<8x8xf32> to vector<8xf32>
    %20 = vector.shape_cast %19 : vector<8xf32> to vector<8x1xf32>
    %21 = vector.broadcast %20 : vector<8x1xf32> to vector<8x8xf32>
    %22 = arith.divf %18, %21 : vector<8x8xf32>
    %c0_11 = arith.constant 0 : index
    %c0_12 = arith.constant 0 : index
    %c0_13 = arith.constant 0 : index
    %23 = vector.load %arg10[%c0_11, %c0_12, %c0_13] : memref<8x8x4xf32, #tpu.memory_space<vmem>>, vector<1x8x4xf32>
    %24 = vector.shape_cast %23 : vector<1x8x4xf32> to vector<8x4xf32>
    %cst_14 = arith.constant dense<0.000000e+00> : vector<8x4xf32>
    %25 = tpu.matmul %22, %24, %cst_14 {dimension_numbers = #tpu.dot_dimension_numbers<[1], [0], [0], [1], [0, 0, 1, 1], [], []>} : vector<8x8xf32>, vector<8x4xf32>, vector<8x4xf32> -> vector<8x4xf32>
    %c0_15 = arith.constant 0 : index
    %c0_16 = arith.constant 0 : index
    %26 = vector.load %arg11[%c0_15, %c0_16] : memref<8x32xf32, #tpu.memory_space<vmem>>, vector<8x4xf32>
    tpu.vector_store %arg11[%c0_15, %c0_16], %25 {strides = array<i32>} : memref<8x32xf32, #tpu.memory_space<vmem>>, vector<8x4xf32>,
    %c1 = arith.constant 1 : index
    %c0_17 = arith.constant 0 : index
    %c0_18 = arith.constant 0 : index
    %27 = vector.load %arg3[%c1, %c0_17, %c0_18] : memref<8x32x4xf32, #tpu.memory_space<vmem>>, vector<1x32x4xf32>
    %28 = vector.shape_cast %27 : vector<1x32x4xf32> to vector<32x4xf32>
    %cst_19 = arith.constant dense<0.000000e+00> : vector<8x4xf32>
    %29 = tpu.matmul %7, %28, %cst_19 {dimension_numbers = #tpu.dot_dimension_numbers<[1], [0], [0], [1], [0, 0, 1, 1], [], []>} : vector<8x32xf32>, vector<32x4xf32>, vector<8x4xf32> -> vector<8x4xf32>
    %c1_20 = arith.constant 1 : index
    %c0_21 = arith.constant 0 : index
    %c0_22 = arith.constant 0 : index
    %30 = vector.load %arg9[%c1_20, %c0_21, %c0_22] : memref<8x8x4xf32, #tpu.memory_space<vmem>>, vector<1x8x4xf32>
    %31 = vector.shape_cast %30 : vector<1x8x4xf32> to vector<8x4xf32>
    %cst_23 = arith.constant dense<0.000000e+00> : vector<8x8xf32>
    %32 = tpu.matmul %29, %31, %cst_23 {dimension_numbers = #tpu.dot_dimension_numbers<[1], [1], [0], [0], [0, 0, 1, 0], [], []>} : vector<8x4xf32>, vector<8x4xf32>, vector<8x8xf32> -> vector<8x8xf32>
    %cst_24 = arith.constant dense<0xFF800000> : vector<8xf32>
    %33 = vector.multi_reduction <maximumf>, %32, %cst_24 [1] : vector<8x8xf32> to vector<8xf32>
    %34 = vector.shape_cast %33 : vector<8xf32> to vector<8x1xf32>
    %35 = vector.broadcast %34 : vector<8x1xf32> to vector<8x8xf32>
    %36 = arith.subf %32, %35 : vector<8x8xf32>
    %37 = math.exp %36 : vector<8x8xf32>
    %cst_25 = arith.constant dense<0.000000e+00> : vector<8xf32>
    %38 = vector.multi_reduction <add>, %37, %cst_25 [1] : vector<8x8xf32> to vector<8xf32>
    %39 = vector.shape_cast %38 : vector<8xf32> to vector<8x1xf32>
    %40 = vector.broadcast %39 : vector<8x1xf32> to vector<8x8xf32>
    %41 = arith.divf %37, %40 : vector<8x8xf32>
    %c1_26 = arith.constant 1 : index
    %c0_27 = arith.constant 0 : index
    %c0_28 = arith.constant 0 : index
    %42 = vector.load %arg10[%c1_26, %c0_27, %c0_28] : memref<8x8x4xf32, #tpu.memory_space<vmem>>, vector<1x8x4xf32>
    %43 = vector.shape_cast %42 : vector<1x8x4xf32> to vector<8x4xf32>
    %cst_29 = arith.constant dense<0.000000e+00> : vector<8x4xf32>
    %44 = tpu.matmul %41, %43, %cst_29 {dimension_numbers = #tpu.dot_dimension_numbers<[1], [0], [0], [1], [0, 0, 1, 1], [], []>} : vector<8x8xf32>, vector<8x4xf32>, vector<8x4xf32> -> vector<8x4xf32>
    %c0_30 = arith.constant 0 : index
    %c4 = arith.constant 4 : index
    %45 = vector.load %arg11[%c0_30, %c4] : memref<8x32xf32, #tpu.memory_space<vmem>>, vector<8x4xf32>
    tpu.vector_store %arg11[%c0_30, %c4], %44 {strides = array<i32>} : memref<8x32xf32, #tpu.memory_space<vmem>>, vector<8x4xf32>,
    %c2 = arith.constant 2 : index
    %c0_31 = arith.constant 0 : index
    %c0_32 = arith.constant 0 : index
    %46 = vector.load %arg3[%c2, %c0_31, %c0_32] : memref<8x32x4xf32, #tpu.memory_space<vmem>>, vector<1x32x4xf32>
    %47 = vector.shape_cast %46 : vector<1x32x4xf32> to vector<32x4xf32>
    %cst_33 = arith.constant dense<0.000000e+00> : vector<8x4xf32>
    %48 = tpu.matmul %7, %47, %cst_33 {dimension_numbers = #tpu.dot_dimension_numbers<[1], [0], [0], [1], [0, 0, 1, 1], [], []>} : vector<8x32xf32>, vector<32x4xf32>, vector<8x4xf32> -> vector<8x4xf32>
    %c2_34 = arith.constant 2 : index
    %c0_35 = arith.constant 0 : index
    %c0_36 = arith.constant 0 : index
    %49 = vector.load %arg9[%c2_34, %c0_35, %c0_36] : memref<8x8x4xf32, #tpu.memory_space<vmem>>, vector<1x8x4xf32>
    %50 = vector.shape_cast %49 : vector<1x8x4xf32> to vector<8x4xf32>
    %cst_37 = arith.constant dense<0.000000e+00> : vector<8x8xf32>
    %51 = tpu.matmul %48, %50, %cst_37 {dimension_numbers = #tpu.dot_dimension_numbers<[1], [1], [0], [0], [0, 0, 1, 0], [], []>} : vector<8x4xf32>, vector<8x4xf32>, vector<8x8xf32> -> vector<8x8xf32>
    %cst_38 = arith.constant dense<0xFF800000> : vector<8xf32>
    %52 = vector.multi_reduction <maximumf>, %51, %cst_38 [1] : vector<8x8xf32> to vector<8xf32>
    %53 = vector.shape_cast %52 : vector<8xf32> to vector<8x1xf32>
    %54 = vector.broadcast %53 : vector<8x1xf32> to vector<8x8xf32>
    %55 = arith.subf %51, %54 : vector<8x8xf32>
    %56 = math.exp %55 : vector<8x8xf32>
    %cst_39 = arith.constant dense<0.000000e+00> : vector<8xf32>
    %57 = vector.multi_reduction <add>, %56, %cst_39 [1] : vector<8x8xf32> to vector<8xf32>
    %58 = vector.shape_cast %57 : vector<8xf32> to vector<8x1xf32>
    %59 = vector.broadcast %58 : vector<8x1xf32> to vector<8x8xf32>
    %60 = arith.divf %56, %59 : vector<8x8xf32>
    %c2_40 = arith.constant 2 : index
    %c0_41 = arith.constant 0 : index
    %c0_42 = arith.constant 0 : index
    %61 = vector.load %arg10[%c2_40, %c0_41, %c0_42] : memref<8x8x4xf32, #tpu.memory_space<vmem>>, vector<1x8x4xf32>
    %62 = vector.shape_cast %61 : vector<1x8x4xf32> to vector<8x4xf32>
    %cst_43 = arith.constant dense<0.000000e+00> : vector<8x4xf32>
    %63 = tpu.matmul %60, %62, %cst_43 {dimension_numbers = #tpu.dot_dimension_numbers<[1], [0], [0], [1], [0, 0, 1, 1], [], []>} : vector<8x8xf32>, vector<8x4xf32>, vector<8x4xf32> -> vector<8x4xf32>
    %c0_44 = arith.constant 0 : index
    %c8 = arith.constant 8 : index
    %64 = vector.load %arg11[%c0_44, %c8] : memref<8x32xf32, #tpu.memory_space<vmem>>, vector<8x4xf32>
    tpu.vector_store %arg11[%c0_44, %c8], %63 {strides = array<i32>} : memref<8x32xf32, #tpu.memory_space<vmem>>, vector<8x4xf32>,
    %c3 = arith.constant 3 : index
    %c0_45 = arith.constant 0 : index
    %c0_46 = arith.constant 0 : index
    %65 = vector.load %arg3[%c3, %c0_45, %c0_46] : memref<8x32x4xf32, #tpu.memory_space<vmem>>, vector<1x32x4xf32>
    %66 = vector.shape_cast %65 : vector<1x32x4xf32> to vector<32x4xf32>
    %cst_47 = arith.constant dense<0.000000e+00> : vector<8x4xf32>
    %67 = tpu.matmul %7, %66, %cst_47 {dimension_numbers = #tpu.dot_dimension_numbers<[1], [0], [0], [1], [0, 0, 1, 1], [], []>} : vector<8x32xf32>, vector<32x4xf32>, vector<8x4xf32> -> vector<8x4xf32>
    %c3_48 = arith.constant 3 : index
    %c0_49 = arith.constant 0 : index
    %c0_50 = arith.constant 0 : index
    %68 = vector.load %arg9[%c3_48, %c0_49, %c0_50] : memref<8x8x4xf32, #tpu.memory_space<vmem>>, vector<1x8x4xf32>
    %69 = vector.shape_cast %68 : vector<1x8x4xf32> to vector<8x4xf32>
    %cst_51 = arith.constant dense<0.000000e+00> : vector<8x8xf32>
    %70 = tpu.matmul %67, %69, %cst_51 {dimension_numbers = #tpu.dot_dimension_numbers<[1], [1], [0], [0], [0, 0, 1, 0], [], []>} : vector<8x4xf32>, vector<8x4xf32>, vector<8x8xf32> -> vector<8x8xf32>
    %cst_52 = arith.constant dense<0xFF800000> : vector<8xf32>
    %71 = vector.multi_reduction <maximumf>, %70, %cst_52 [1] : vector<8x8xf32> to vector<8xf32>
    %72 = vector.shape_cast %71 : vector<8xf32> to vector<8x1xf32>
    %73 = vector.broadcast %72 : vector<8x1xf32> to vector<8x8xf32>
    %74 = arith.subf %70, %73 : vector<8x8xf32>
    %75 = math.exp %74 : vector<8x8xf32>
    %cst_53 = arith.constant dense<0.000000e+00> : vector<8xf32>
    %76 = vector.multi_reduction <add>, %75, %cst_53 [1] : vector<8x8xf32> to vector<8xf32>
    %77 = vector.shape_cast %76 : vector<8xf32> to vector<8x1xf32>
    %78 = vector.broadcast %77 : vector<8x1xf32> to vector<8x8xf32>
    %79 = arith.divf %75, %78 : vector<8x8xf32>
    %c3_54 = arith.constant 3 : index
    %c0_55 = arith.constant 0 : index
    %c0_56 = arith.constant 0 : index
    %80 = vector.load %arg10[%c3_54, %c0_55, %c0_56] : memref<8x8x4xf32, #tpu.memory_space<vmem>>, vector<1x8x4xf32>
    %81 = vector.shape_cast %80 : vector<1x8x4xf32> to vector<8x4xf32>
    %cst_57 = arith.constant dense<0.000000e+00> : vector<8x4xf32>
    %82 = tpu.matmul %79, %81, %cst_57 {dimension_numbers = #tpu.dot_dimension_numbers<[1], [0], [0], [1], [0, 0, 1, 1], [], []>} : vector<8x8xf32>, vector<8x4xf32>, vector<8x4xf32> -> vector<8x4xf32>
    %c0_58 = arith.constant 0 : index
    %c12 = arith.constant 12 : index
    %83 = vector.load %arg11[%c0_58, %c12] : memref<8x32xf32, #tpu.memory_space<vmem>>, vector<8x4xf32>
    tpu.vector_store %arg11[%c0_58, %c12], %82 {strides = array<i32>} : memref<8x32xf32, #tpu.memory_space<vmem>>, vector<8x4xf32>,
    %c4_59 = arith.constant 4 : index
    %c0_60 = arith.constant 0 : index
    %c0_61 = arith.constant 0 : index
    %84 = vector.load %arg3[%c4_59, %c0_60, %c0_61] : memref<8x32x4xf32, #tpu.memory_space<vmem>>, vector<1x32x4xf32>
    %85 = vector.shape_cast %84 : vector<1x32x4xf32> to vector<32x4xf32>
    %cst_62 = arith.constant dense<0.000000e+00> : vector<8x4xf32>
    %86 = tpu.matmul %7, %85, %cst_62 {dimension_numbers = #tpu.dot_dimension_numbers<[1], [0], [0], [1], [0, 0, 1, 1], [], []>} : vector<8x32xf32>, vector<32x4xf32>, vector<8x4xf32> -> vector<8x4xf32>
    %c4_63 = arith.constant 4 : index
    %c0_64 = arith.constant 0 : index
    %c0_65 = arith.constant 0 : index
    %87 = vector.load %arg9[%c4_63, %c0_64, %c0_65] : memref<8x8x4xf32, #tpu.memory_space<vmem>>, vector<1x8x4xf32>
    %88 = vector.shape_cast %87 : vector<1x8x4xf32> to vector<8x4xf32>
    %cst_66 = arith.constant dense<0.000000e+00> : vector<8x8xf32>
    %89 = tpu.matmul %86, %88, %cst_66 {dimension_numbers = #tpu.dot_dimension_numbers<[1], [1], [0], [0], [0, 0, 1, 0], [], []>} : vector<8x4xf32>, vector<8x4xf32>, vector<8x8xf32> -> vector<8x8xf32>
    %cst_67 = arith.constant dense<0xFF800000> : vector<8xf32>
    %90 = vector.multi_reduction <maximumf>, %89, %cst_67 [1] : vector<8x8xf32> to vector<8xf32>
    %91 = vector.shape_cast %90 : vector<8xf32> to vector<8x1xf32>
    %92 = vector.broadcast %91 : vector<8x1xf32> to vector<8x8xf32>
    %93 = arith.subf %89, %92 : vector<8x8xf32>
    %94 = math.exp %93 : vector<8x8xf32>
    %cst_68 = arith.constant dense<0.000000e+00> : vector<8xf32>
    %95 = vector.multi_reduction <add>, %94, %cst_68 [1] : vector<8x8xf32> to vector<8xf32>
    %96 = vector.shape_cast %95 : vector<8xf32> to vector<8x1xf32>
    %97 = vector.broadcast %96 : vector<8x1xf32> to vector<8x8xf32>
    %98 = arith.divf %94, %97 : vector<8x8xf32>
    %c4_69 = arith.constant 4 : index
    %c0_70 = arith.constant 0 : index
    %c0_71 = arith.constant 0 : index
    %99 = vector.load %arg10[%c4_69, %c0_70, %c0_71] : memref<8x8x4xf32, #tpu.memory_space<vmem>>, vector<1x8x4xf32>
    %100 = vector.shape_cast %99 : vector<1x8x4xf32> to vector<8x4xf32>
    %cst_72 = arith.constant dense<0.000000e+00> : vector<8x4xf32>
    %101 = tpu.matmul %98, %100, %cst_72 {dimension_numbers = #tpu.dot_dimension_numbers<[1], [0], [0], [1], [0, 0, 1, 1], [], []>} : vector<8x8xf32>, vector<8x4xf32>, vector<8x4xf32> -> vector<8x4xf32>
    %c0_73 = arith.constant 0 : index
    %c16 = arith.constant 16 : index
    %102 = vector.load %arg11[%c0_73, %c16] : memref<8x32xf32, #tpu.memory_space<vmem>>, vector<8x4xf32>
    tpu.vector_store %arg11[%c0_73, %c16], %101 {strides = array<i32>} : memref<8x32xf32, #tpu.memory_space<vmem>>, vector<8x4xf32>,
    %c5 = arith.constant 5 : index
    %c0_74 = arith.constant 0 : index
    %c0_75 = arith.constant 0 : index
    %103 = vector.load %arg3[%c5, %c0_74, %c0_75] : memref<8x32x4xf32, #tpu.memory_space<vmem>>, vector<1x32x4xf32>
    %104 = vector.shape_cast %103 : vector<1x32x4xf32> to vector<32x4xf32>
    %cst_76 = arith.constant dense<0.000000e+00> : vector<8x4xf32>
    %105 = tpu.matmul %7, %104, %cst_76 {dimension_numbers = #tpu.dot_dimension_numbers<[1], [0], [0], [1], [0, 0, 1, 1], [], []>} : vector<8x32xf32>, vector<32x4xf32>, vector<8x4xf32> -> vector<8x4xf32>
    %c5_77 = arith.constant 5 : index
    %c0_78 = arith.constant 0 : index
    %c0_79 = arith.constant 0 : index
    %106 = vector.load %arg9[%c5_77, %c0_78, %c0_79] : memref<8x8x4xf32, #tpu.memory_space<vmem>>, vector<1x8x4xf32>
    %107 = vector.shape_cast %106 : vector<1x8x4xf32> to vector<8x4xf32>
    %cst_80 = arith.constant dense<0.000000e+00> : vector<8x8xf32>
    %108 = tpu.matmul %105, %107, %cst_80 {dimension_numbers = #tpu.dot_dimension_numbers<[1], [1], [0], [0], [0, 0, 1, 0], [], []>} : vector<8x4xf32>, vector<8x4xf32>, vector<8x8xf32> -> vector<8x8xf32>
    %cst_81 = arith.constant dense<0xFF800000> : vector<8xf32>
    %109 = vector.multi_reduction <maximumf>, %108, %cst_81 [1] : vector<8x8xf32> to vector<8xf32>
    %110 = vector.shape_cast %109 : vector<8xf32> to vector<8x1xf32>
    %111 = vector.broadcast %110 : vector<8x1xf32> to vector<8x8xf32>
    %112 = arith.subf %108, %111 : vector<8x8xf32>
    %113 = math.exp %112 : vector<8x8xf32>
    %cst_82 = arith.constant dense<0.000000e+00> : vector<8xf32>
    %114 = vector.multi_reduction <add>, %113, %cst_82 [1] : vector<8x8xf32> to vector<8xf32>
    %115 = vector.shape_cast %114 : vector<8xf32> to vector<8x1xf32>
    %116 = vector.broadcast %115 : vector<8x1xf32> to vector<8x8xf32>
    %117 = arith.divf %113, %116 : vector<8x8xf32>
    %c5_83 = arith.constant 5 : index
    %c0_84 = arith.constant 0 : index
    %c0_85 = arith.constant 0 : index
    %118 = vector.load %arg10[%c5_83, %c0_84, %c0_85] : memref<8x8x4xf32, #tpu.memory_space<vmem>>, vector<1x8x4xf32>
    %119 = vector.shape_cast %118 : vector<1x8x4xf32> to vector<8x4xf32>
    %cst_86 = arith.constant dense<0.000000e+00> : vector<8x4xf32>
    %120 = tpu.matmul %117, %119, %cst_86 {dimension_numbers = #tpu.dot_dimension_numbers<[1], [0], [0], [1], [0, 0, 1, 1], [], []>} : vector<8x8xf32>, vector<8x4xf32>, vector<8x4xf32> -> vector<8x4xf32>
    %c0_87 = arith.constant 0 : index
    %c20 = arith.constant 20 : index
    %121 = vector.load %arg11[%c0_87, %c20] : memref<8x32xf32, #tpu.memory_space<vmem>>, vector<8x4xf32>
    tpu.vector_store %arg11[%c0_87, %c20], %120 {strides = array<i32>} : memref<8x32xf32, #tpu.memory_space<vmem>>, vector<8x4xf32>,
    %c6 = arith.constant 6 : index
    %c0_88 = arith.constant 0 : index
    %c0_89 = arith.constant 0 : index
    %122 = vector.load %arg3[%c6, %c0_88, %c0_89] : memref<8x32x4xf32, #tpu.memory_space<vmem>>, vector<1x32x4xf32>
    %123 = vector.shape_cast %122 : vector<1x32x4xf32> to vector<32x4xf32>
    %cst_90 = arith.constant dense<0.000000e+00> : vector<8x4xf32>
    %124 = tpu.matmul %7, %123, %cst_90 {dimension_numbers = #tpu.dot_dimension_numbers<[1], [0], [0], [1], [0, 0, 1, 1], [], []>} : vector<8x32xf32>, vector<32x4xf32>, vector<8x4xf32> -> vector<8x4xf32>
    %c6_91 = arith.constant 6 : index
    %c0_92 = arith.constant 0 : index
    %c0_93 = arith.constant 0 : index
    %125 = vector.load %arg9[%c6_91, %c0_92, %c0_93] : memref<8x8x4xf32, #tpu.memory_space<vmem>>, vector<1x8x4xf32>
    %126 = vector.shape_cast %125 : vector<1x8x4xf32> to vector<8x4xf32>
    %cst_94 = arith.constant dense<0.000000e+00> : vector<8x8xf32>
    %127 = tpu.matmul %124, %126, %cst_94 {dimension_numbers = #tpu.dot_dimension_numbers<[1], [1], [0], [0], [0, 0, 1, 0], [], []>} : vector<8x4xf32>, vector<8x4xf32>, vector<8x8xf32> -> vector<8x8xf32>
    %cst_95 = arith.constant dense<0xFF800000> : vector<8xf32>
    %128 = vector.multi_reduction <maximumf>, %127, %cst_95 [1] : vector<8x8xf32> to vector<8xf32>
    %129 = vector.shape_cast %128 : vector<8xf32> to vector<8x1xf32>
    %130 = vector.broadcast %129 : vector<8x1xf32> to vector<8x8xf32>
    %131 = arith.subf %127, %130 : vector<8x8xf32>
    %132 = math.exp %131 : vector<8x8xf32>
    %cst_96 = arith.constant dense<0.000000e+00> : vector<8xf32>
    %133 = vector.multi_reduction <add>, %132, %cst_96 [1] : vector<8x8xf32> to vector<8xf32>
    %134 = vector.shape_cast %133 : vector<8xf32> to vector<8x1xf32>
    %135 = vector.broadcast %134 : vector<8x1xf32> to vector<8x8xf32>
    %136 = arith.divf %132, %135 : vector<8x8xf32>
    %c6_97 = arith.constant 6 : index
    %c0_98 = arith.constant 0 : index
    %c0_99 = arith.constant 0 : index
    %137 = vector.load %arg10[%c6_97, %c0_98, %c0_99] : memref<8x8x4xf32, #tpu.memory_space<vmem>>, vector<1x8x4xf32>
    %138 = vector.shape_cast %137 : vector<1x8x4xf32> to vector<8x4xf32>
    %cst_100 = arith.constant dense<0.000000e+00> : vector<8x4xf32>
    %139 = tpu.matmul %136, %138, %cst_100 {dimension_numbers = #tpu.dot_dimension_numbers<[1], [0], [0], [1], [0, 0, 1, 1], [], []>} : vector<8x8xf32>, vector<8x4xf32>, vector<8x4xf32> -> vector<8x4xf32>
    %c0_101 = arith.constant 0 : index
    %c24 = arith.constant 24 : index
    %140 = vector.load %arg11[%c0_101, %c24] : memref<8x32xf32, #tpu.memory_space<vmem>>, vector<8x4xf32>
    tpu.vector_store %arg11[%c0_101, %c24], %139 {strides = array<i32>} : memref<8x32xf32, #tpu.memory_space<vmem>>, vector<8x4xf32>,
    %c7 = arith.constant 7 : index
    %c0_102 = arith.constant 0 : index
    %c0_103 = arith.constant 0 : index
    %141 = vector.load %arg3[%c7, %c0_102, %c0_103] : memref<8x32x4xf32, #tpu.memory_space<vmem>>, vector<1x32x4xf32>
    %142 = vector.shape_cast %141 : vector<1x32x4xf32> to vector<32x4xf32>
    %cst_104 = arith.constant dense<0.000000e+00> : vector<8x4xf32>
    %143 = tpu.matmul %7, %142, %cst_104 {dimension_numbers = #tpu.dot_dimension_numbers<[1], [0], [0], [1], [0, 0, 1, 1], [], []>} : vector<8x32xf32>, vector<32x4xf32>, vector<8x4xf32> -> vector<8x4xf32>
    %c7_105 = arith.constant 7 : index
    %c0_106 = arith.constant 0 : index
    %c0_107 = arith.constant 0 : index
    %144 = vector.load %arg9[%c7_105, %c0_106, %c0_107] : memref<8x8x4xf32, #tpu.memory_space<vmem>>, vector<1x8x4xf32>
    %145 = vector.shape_cast %144 : vector<1x8x4xf32> to vector<8x4xf32>
    %cst_108 = arith.constant dense<0.000000e+00> : vector<8x8xf32>
    %146 = tpu.matmul %143, %145, %cst_108 {dimension_numbers = #tpu.dot_dimension_numbers<[1], [1], [0], [0], [0, 0, 1, 0], [], []>} : vector<8x4xf32>, vector<8x4xf32>, vector<8x8xf32> -> vector<8x8xf32>
    %cst_109 = arith.constant dense<0xFF800000> : vector<8xf32>
    %147 = vector.multi_reduction <maximumf>, %146, %cst_109 [1] : vector<8x8xf32> to vector<8xf32>
    %148 = vector.shape_cast %147 : vector<8xf32> to vector<8x1xf32>
    %149 = vector.broadcast %148 : vector<8x1xf32> to vector<8x8xf32>
    %150 = arith.subf %146, %149 : vector<8x8xf32>
    %151 = math.exp %150 : vector<8x8xf32>
    %cst_110 = arith.constant dense<0.000000e+00> : vector<8xf32>
    %152 = vector.multi_reduction <add>, %151, %cst_110 [1] : vector<8x8xf32> to vector<8xf32>
    %153 = vector.shape_cast %152 : vector<8xf32> to vector<8x1xf32>
    %154 = vector.broadcast %153 : vector<8x1xf32> to vector<8x8xf32>
    %155 = arith.divf %151, %154 : vector<8x8xf32>
    %c7_111 = arith.constant 7 : index
    %c0_112 = arith.constant 0 : index
    %c0_113 = arith.constant 0 : index
    %156 = vector.load %arg10[%c7_111, %c0_112, %c0_113] : memref<8x8x4xf32, #tpu.memory_space<vmem>>, vector<1x8x4xf32>
    %157 = vector.shape_cast %156 : vector<1x8x4xf32> to vector<8x4xf32>
    %cst_114 = arith.constant dense<0.000000e+00> : vector<8x4xf32>
    %158 = tpu.matmul %155, %157, %cst_114 {dimension_numbers = #tpu.dot_dimension_numbers<[1], [0], [0], [1], [0, 0, 1, 1], [], []>} : vector<8x8xf32>, vector<8x4xf32>, vector<8x4xf32> -> vector<8x4xf32>
    %c0_115 = arith.constant 0 : index
    %c28 = arith.constant 28 : index
    %159 = vector.load %arg11[%c0_115, %c28] : memref<8x32xf32, #tpu.memory_space<vmem>>, vector<8x4xf32>
    tpu.vector_store %arg11[%c0_115, %c28], %158 {strides = array<i32>} : memref<8x32xf32, #tpu.memory_space<vmem>>, vector<8x4xf32>,
    %c0_116 = arith.constant 0 : index
    %c0_117 = arith.constant 0 : index
    %160 = vector.load %arg11[%c0_116, %c0_117] : memref<8x32xf32, #tpu.memory_space<vmem>>, vector<8x32xf32>
    %c0_118 = arith.constant 0 : index
    %c0_119 = arith.constant 0 : index
    %161 = vector.load %arg6[%c0_118, %c0_119] : memref<32x32xf32, #tpu.memory_space<vmem>>, vector<32x32xf32>
    %cst_120 = arith.constant dense<0.000000e+00> : vector<8x32xf32>
    %162 = tpu.matmul %160, %161, %cst_120 {dimension_numbers = #tpu.dot_dimension_numbers<[1], [0], [0], [1], [0, 0, 1, 1], [], []>} : vector<8x32xf32>, vector<32x32xf32>, vector<8x32xf32> -> vector<8x32xf32>
    %c0_121 = arith.constant 0 : index
    %c0_122 = arith.constant 0 : index
    %163 = vector.load %arg7[%c0_121, %c0_122] : memref<1x32xf32, #tpu.memory_space<vmem>>, vector<1x32xf32>
    %164 = vector.broadcast %163 : vector<1x32xf32> to vector<8x32xf32>
    %165 = arith.addf %162, %164 : vector<8x32xf32>
    %c0_123 = arith.constant 0 : index
    %c0_124 = arith.constant 0 : index
    %c0_125 = arith.constant 0 : index
    %166 = vector.load %arg8[%c0_123, %c0_124, %c0_125] : memref<1x8x32xf32, #tpu.memory_space<vmem>>, vector<1x8x32xf32>
    %167 = vector.shape_cast %166 : vector<1x8x32xf32> to vector<8x32xf32>
    %168 = vector.shape_cast %165 : vector<8x32xf32> to vector<1x8x32xf32>
    tpu.vector_store %arg8[%c0_123, %c0_124, %c0_125], %168 {strides = array<i32>} : memref<1x8x32xf32, #tpu.memory_space<vmem>>, vector<1x8x32xf32>,
    return
  }
  func.func @transform_0(%arg0: i32, %arg1: i32) -> (i32, i32, i32) {
    %c0_i32 = arith.constant 0 : i32
    %c0_i32_0 = arith.constant 0 : i32
    %c0_i32_1 = arith.constant 0 : i32
    return %arg0, %c0_i32, %c0_i32_0 : i32, i32, i32
  }
  func.func @transform_1(%arg0: i32, %arg1: i32) -> (i32, i32, i32) {
    %c0_i32 = arith.constant 0 : i32
    %c0_i32_0 = arith.constant 0 : i32
    %c0_i32_1 = arith.constant 0 : i32
    %c0_i32_2 = arith.constant 0 : i32
    return %c0_i32, %c0_i32_0, %c0_i32_1 : i32, i32, i32
  }
  func.func @transform_2(%arg0: i32, %arg1: i32) -> (i32, i32, i32) {
    %c0_i32 = arith.constant 0 : i32
    %c0_i32_0 = arith.constant 0 : i32
    %c0_i32_1 = arith.constant 0 : i32
    %c0_i32_2 = arith.constant 0 : i32
    return %c0_i32, %c0_i32_0, %c0_i32_1 : i32, i32, i32
  }
  func.func @transform_3(%arg0: i32, %arg1: i32) -> (i32, i32, i32) {
    %c0_i32 = arith.constant 0 : i32
    %c0_i32_0 = arith.constant 0 : i32
    %c0_i32_1 = arith.constant 0 : i32
    %c0_i32_2 = arith.constant 0 : i32
    return %c0_i32, %c0_i32_0, %c0_i32_1 : i32, i32, i32
  }
  func.func @transform_4(%arg0: i32, %arg1: i32) -> (i32, i32) {
    %c0_i32 = arith.constant 0 : i32
    %c0_i32_0 = arith.constant 0 : i32
    %c0_i32_1 = arith.constant 0 : i32
    return %c0_i32, %c0_i32_0 : i32, i32
  }
  func.func @transform_5(%arg0: i32, %arg1: i32) -> (i32, i32) {
    %c0_i32 = arith.constant 0 : i32
    %c0_i32_0 = arith.constant 0 : i32
    %c0_i32_1 = arith.constant 0 : i32
    return %c0_i32, %c0_i32_0 : i32, i32
  }
  func.func @transform_6(%arg0: i32, %arg1: i32) -> (i32, i32, i32) {
    %c0_i32 = arith.constant 0 : i32
    %c0_i32_0 = arith.constant 0 : i32
    return %arg0, %arg1, %c0_i32 : i32, i32, i32
  }
}

</mosaic_0001>

<bundles_post_ra>
// kernel: tpu_custom_call.1
= control target key start
LH: loop header
LB: loop body
LE: loop exit
PB: predicated region body
PF: predicated region fallthrough
CT: control target
= control target key end

     0   :  { %11 = vsyncpa [#allocation6], 0  ;;  %s5345_s0 = inlined_call_operand.vmem [shape: f32[2,8,32], index: 0, kind: input, shape index: {}]   ;;  %s5346_s1 = inlined_call_operand.vmem [shape: f32[8,32,4], index: 1, kind: input, shape index: {}]   ;;  %s5347_s2 = inlined_call_operand.vmem [shape: f32[8,32,4], index: 2, kind: input, shape index: {}]   ;;  %s5348_s3 = inlined_call_operand.vmem [shape: f32[8,32,4], index: 3, kind: input, shape index: {}]   ;;  %s5349_s4 = inlined_call_operand.vmem [shape: f32[32,32], index: 4, kind: input, shape index: {}]   ;;  %s5350_s5 = inlined_call_operand.vmem [shape: f32[1,32], index: 5, kind: input, shape index: {}]   ;;  %s5351_s6 = inlined_call_operand.hbm [shape: f32[2,8,32], index: 6, kind: output, shape index: {}]  }
   0x1   :  { %13 = vsyncpa [#allocation6 + $0x1], 0  ;;  %s4661_s21 = smov 0   ;;  %s4663_s22 = smov 0  }
   0x2   :  { %s4665_s23 = smov 0   ;;  %s4667_s24 = smov 0  }
   0x3   :  { %s4669_s25 = smov 0   ;;  %s4671_s26 = smov 0  }
   0x4 LB: > { %s3631_s27 = sadd.s32 4294967295, %s4613_s26   ;;  %s3632_s28 = sadd.s32 4294967294, %s4613_s26   ;;  %s4613_s26 = sphi %s4671_s26, %s19_s26   ;;  %s4609_s25 = sphi %s4669_s25, %s5358_s25   ;;  %s4605_s24 = sphi %s4667_s24, %s5357_s24   ;;  %s4601_s23 = sphi %s4665_s23, %s5356_s23   ;;  %s4597_s22 = sphi %s4663_s22, %s5355_s22   ;;  %s4593_s21 = sphi %s4661_s21, %s5354_s21  }
   0x5   : > { %s31_s29 = sadd.s32 1, %s4609_s25  ;;  %s171_s30 = sadd.s32 1, %s4601_s23 }
   0x6   : > { %p33_p0 = scmp.ge.s32.totalorder %s31_s29, 2  ;;  %p181_p1 = scmp.ne.s32.totalorder %s4601_s23, %s4597_s22 }
   0x7   : > { %p182_p2 = scmp.eq.s32.totalorder %s3631_s27, 1  ;;  %p187_p3 = scmp.ne.s32.totalorder %s4597_s22, %s4593_s21 }
   0x8   : > { %s5360_s29 = smov (%p33_p0, %s31_s29), 0  ;;  %p188_p5 = scmp.eq.s32.totalorder %s3632_s28, 1 }
   0x9   : > { %p4701_p4 = por %p182_p2, %p181_p1  ;;  %s166_s8 = ssub.s32 %s4609_s25, %s5360_s29 }
   0xa   : > { %p3635_p6 = scmp.ge.s32.totalorder %s4613_s26, 1  ;;  %p169_p7 = scmp.eq.s32.totalorder %s166_s8, 0 }
   0xb   : > { %p4708_p8 = por %p188_p5, %p187_p3  ;;  %p228_p9 = scmp.lt.s32.totalorder %s4613_s26, 3 }
   0xc   : > { %s4714_s10 = scalar_select %p169_p7, %s4601_s23, %s171_s30  }
   0xd   : > { %p229_p10 = pnand %p3635_p6, %p228_p9 }
   0xe   : > { %v266_v0 = vld [vmem:[%s5347_s2] sm:$0xff] (!%p229_p10)  ;;  %v267_v1 = vld [vmem:[%s5347_s2 + $0x8] sm:$0xff] (!%p229_p10)  ;;  %v268_v2 = vld [vmem:[%s5347_s2 + $0x10] sm:$0xff] (!%p229_p10)  ;;  %v4615_v3 = vmov (!%p229_p10), 0.0|0.0   ;;  %vm4616_vm0 = vmmov (!%p229_p10), 0   ;;  %v4617_v6 = vmov (!%p229_p10), 0.0  }
   0xf   : > { %232 = sbr.rel (%p229_p10) target bundleno = 5102 (0x13ee), region = 44  ;;  %4288 = vmatprep.subr.bf16.mxu0 (!%p229_p10), %v4615_v3  ;;  %v4289_v4 = vpack.c.bf16 (!%p229_p10), %v267_v1, %v266_v0  ;;  %v269_v5 = vld [vmem:[%s5347_s2 + $0x18] sm:$0xff] (!%p229_p10)  ;;  %3941 = vmatprep.mubr.msk.f32.mxu0 (!%p229_p10), %vm4616_vm0, %v4617_v6  ;;  %p257_p11 = scmp.lt.s32.totalorder (!%p229_p10), %s4605_s24, 1  ;;  %v3640_v8 = vld [vmem:[%s5347_s2 + $0x20] sm:$0xff] (!%p229_p10)  ;;  %v3641_v9 = vld [vmem:[%s5347_s2 + $0x28] sm:$0xff] (!%p229_p10)  ;;  %vm270_vm1 = vcmask (!%p229_p10), 261120  }
  0x10   : > { %4294 = vmatprep.subr.bf16.mxu1 (!%p229_p10), %v4615_v3  ;;  %3952 = vmatprep.mubr.msk.f32.mxu1 (!%p229_p10), %vm4616_vm0, %v4617_v6  ;;  %v4292_v7 = vpack.c.bf16 (!%p229_p10), %v269_v5, %v268_v2  ;;  %v4301_v11 = vpack.c.bf16 (!%p229_p10), %v3641_v9, %v3640_v8  ;;  %v3642_v12 = vld [vmem:[%s5347_s2 + $0x30] sm:$0xff] (!%p229_p10)  ;;  %v3643_v13 = vld [vmem:[%s5347_s2 + $0x38] sm:$0xff] (!%p229_p10)  ;;  %v3650_v15 = vld [vmem:[%s5347_s2 + $0x40] sm:$0xff] (!%p229_p10)  ;;  %vm344_vm2 = vcmask (!%p229_p10), 31744   ;;  %vm1658_vm3 = vcmask (!%p229_p10), 64512   ;;  %s4618_s12 = smov (!%p229_p10), 4  }
  0x11   : > { %4290 = vmatpush3.bf16.msra.mxu0 (!%p229_p10), %v4289_v4  ;;  %v4304_v14 = vpack.c.bf16 (!%p229_p10), %v3643_v13, %v3642_v12  ;;  %v3651_v16 = vld [vmem:[%s5347_s2 + $0x48] sm:$0xff] (!%p229_p10)  ;;  %v346_v17 = vld [vmem:[%s5348_s3] sm:$0xff] (!%p229_p10)  ;;  %v348_v20 = vld [vmem:[%s5348_s3 + $0x10] sm:$0xff] (!%p229_p10)  ;;  %vm1988_vm4 = vcmask (!%p229_p10), 64544   ;;  %s4620_s14 = smov (!%p229_p10), 8   ;;  %s4621_s15 = smov (!%p229_p10), 12  }
  0x12   : > { %4291 = vmatprep.subr.bf16.mxu0 (!%p229_p10), %v4615_v3  ;;  %v347_v18 = vld [vmem:[%s5348_s3 + $0x8] sm:$0xff] (!%p229_p10)  ;;  %v349_v21 = vld [vmem:[%s5348_s3 + $0x18] sm:$0xff] (!%p229_p10)  ;;  %v4313_v22 = vpack.c.bf16 (!%p229_p10), %v3651_v16, %v3650_v15  ;;  %v3652_v23 = vld [vmem:[%s5347_s2 + $0x50] sm:$0xff] (!%p229_p10)  ;;  %s4622_s16 = smov (!%p229_p10), 16   ;;  %s4623_s17 = smov (!%p229_p10), 24   ;;  %vm2233_vm5 = vcmask (!%p229_p10), 97344  }
  0x13   : > { %v4295_v19 = vpack.c.bf16 (!%p229_p10), %v347_v18, %v346_v17  ;;  %v3653_v24 = vld [vmem:[%s5347_s2 + $0x58] sm:$0xff] (!%p229_p10)  ;;  %v4298_v25 = vpack.c.bf16 (!%p229_p10), %v349_v21, %v348_v20  ;;  %v3645_v26 = vld [vmem:[%s5348_s3 + $0x20] sm:$0xff] (!%p229_p10)  ;;  %v3646_v27 = vld [vmem:[%s5348_s3 + $0x28] sm:$0xff] (!%p229_p10)  ;;  %vm2478_vm6 = vcmask (!%p229_p10), 130144   ;;  %vm2723_vm7 = vcmask (!%p229_p10), 162944  }
  0x14   : > { %v4316_v28 = vpack.c.bf16 (!%p229_p10), %v3653_v24, %v3652_v23  ;;  %v3660_v29 = vld [vmem:[%s5347_s2 + $0x60] sm:$0xff] (!%p229_p10)  ;;  %v3661_v30 = vld [vmem:[%s5347_s2 + $0x68] sm:$0xff] (!%p229_p10)  ;;  %v4307_v31 = vpack.c.bf16 (!%p229_p10), %v3646_v27, %v3645_v26  ;;  %v3647_v32 = vld [vmem:[%s5348_s3 + $0x30] sm:$0xff] (!%p229_p10)  ;;  %vm2968_vm8 = vcmask (!%p229_p10), 195744   ;;  %vm3213_vm9 = vcmask (!%p229_p10), 228544  }
  0x15   : > { %4293 = vmatpush3.bf16.msra.mxu0 (!%p229_p10), %v4292_v7  ;;  %4296 = vmatpush3.bf16.msra.mxu1 (!%p229_p10), %v4295_v19  ;;  %v3648_v33 = vld [vmem:[%s5348_s3 + $0x38] sm:$0xff] (!%p229_p10)  ;;  %v4325_v34 = vpack.c.bf16 (!%p229_p10), %v3661_v30, %v3660_v29  ;;  %v3662_v35 = vld [vmem:[%s5347_s2 + $0x70] sm:$0xff] (!%p229_p10)  ;;  %v3655_v38 = vld [vmem:[%s5348_s3 + $0x40] sm:$0xff] (!%p229_p10)  ;;  %vm3458_vm10 = vcmask (!%p229_p10), 261344  }
  0x16   : > { %s258_s19 = scalar_select %p257_p11, %s4605_s24, 1  ;;  %4300 = vmatprep.subr.bf16.mxu0 %v4615_v3  ;;  %4297 = vmatprep.subr.bf16.mxu1 %v4615_v3  ;;  %v3663_v36 = vld [vmem:[%s5347_s2 + $0x78] sm:$0xff]  ;;  %v4310_v37 = vpack.c.bf16 %v3648_v33, %v3647_v32  ;;  %v3656_v39 = vld [vmem:[%s5348_s3 + $0x48] sm:$0xff]  ;;  %v3670_v41 = vld [vmem:[%s5347_s2 + $0x80] sm:$0xff] }
  0x17   : > { %v4328_v40 = vpack.c.bf16 %v3663_v36, %v3662_v35  ;;  %v3671_v42 = vld [vmem:[%s5347_s2 + $0x88] sm:$0xff]  ;;  %v4319_v43 = vpack.c.bf16 %v3656_v39, %v3655_v38  ;;  %v3657_v44 = vld [vmem:[%s5348_s3 + $0x50] sm:$0xff]  ;;  %v3658_v45 = vld [vmem:[%s5348_s3 + $0x58] sm:$0xff] }
  0x18   : > { %s3637_s8 = sshll.u32 %s258_s19, 3  ;;  %v4337_v46 = vpack.c.bf16 %v3671_v42, %v3670_v41  ;;  %v3672_v47 = vld [vmem:[%s5347_s2 + $0x90] sm:$0xff]  ;;  %v3673_v48 = vld [vmem:[%s5347_s2 + $0x98] sm:$0xff]  ;;  %v4322_v49 = vpack.c.bf16 %v3658_v45, %v3657_v44  ;;  %v3665_v50 = vld [vmem:[%s5348_s3 + $0x60] sm:$0xff] }
  0x19   : > { %s260_s13 = scalar_lea.vmem %s5345_s0, %s3637_s8  ;;  %4299 = vmatpush3.bf16.msra.mxu1 %v4298_v25  ;;  %v3666_v51 = vld [vmem:[%s5348_s3 + $0x68] sm:$0xff]  ;;  %v4340_v52 = vpack.c.bf16 %v3673_v48, %v3672_v47  ;;  %v3680_v53 = vld [vmem:[%s5347_s2 + $0xa0] sm:$0xff]  ;;  %v3667_v56 = vld [vmem:[%s5348_s3 + $0x70] sm:$0xff] }
  0x1a   : > { %v4746_v10 = vld [vmem:[%s260_s13] sm:$0xff]  ;;  %4306 = vmatprep.subr.bf16.mxu1 %v4615_v3  ;;  %v3681_v54 = vld [vmem:[%s5347_s2 + $0xa8] sm:$0xff]  ;;  %v4331_v55 = vpack.c.bf16 %v3666_v51, %v3665_v50  ;;  %v3668_v57 = vld [vmem:[%s5348_s3 + $0x78] sm:$0xff]  ;;  %s4619_s13 = smov 20  }
  0x1b   : > { %3942 = vmatmul.mubr.msk.f32.vlgmr.msra.gmra.mrb[0].mxu0 %vm270_vm1, %v4746_v10  ;;  %v4349_v58 = vpack.c.bf16 %v3681_v54, %v3680_v53  ;;  %v3682_v59 = vld [vmem:[%s5347_s2 + $0xb0] sm:$0xff]  ;;  %v3683_v60 = vld [vmem:[%s5347_s2 + $0xb8] sm:$0xff]  ;;  %v4334_v61 = vpack.c.bf16 %v3668_v57, %v3667_v56  ;;  %v3675_v62 = vld [vmem:[%s5348_s3 + $0x80] sm:$0xff] }
  0x1c   : > { %4302 = vmatpush3.bf16.msra.mxu0 %v4301_v11  ;;  %3963 = vmatprep.mubr.msk.f32.mxu0 %vm4616_vm0, %v4617_v6  ;;  %v3676_v63 = vld [vmem:[%s5348_s3 + $0x88] sm:$0xff]  ;;  %v4352_v0 = vpack.c.bf16 %v3683_v60, %v3682_v59  ;;  %v3690_v1 = vld [vmem:[%s5347_s2 + $0xc0] sm:$0xff]  ;;  %v3677_v5 = vld [vmem:[%s5348_s3 + $0x90] sm:$0xff] }
  0x1d   : > { %4303 = vmatprep.subr.bf16.mxu0 %v4615_v3  ;;  %3953 = vmatmul.mubr.msk.f32.vlgmr.msra.gmra.mrb[0].mxu1 %vm270_vm1, %v4746_v10  ;;  %v3691_v2 = vld [vmem:[%s5347_s2 + $0xc8] sm:$0xff]  ;;  %v4343_v4 = vpack.c.bf16 %v3676_v63, %v3675_v62  ;;  %v3678_v7 = vld [vmem:[%s5348_s3 + $0x98] sm:$0xff]  ;;  %v3692_v9 = vld [vmem:[%s5347_s2 + $0xd0] sm:$0xff] }
  0x1e   : > { %4308 = vmatpush3.bf16.msra.mxu1 %v4307_v31  ;;  %3974 = vmatprep.mubr.msk.f32.mxu1 %vm4616_vm0, %v4617_v6  ;;  %v4361_v8 = vpack.c.bf16 %v3691_v2, %v3690_v1  ;;  %v3693_v11 = vld [vmem:[%s5347_s2 + $0xd8] sm:$0xff]  ;;  %v4346_v12 = vpack.c.bf16 %v3678_v7, %v3677_v5  ;;  %v3685_v13 = vld [vmem:[%s5348_s3 + $0xa0] sm:$0xff]  ;;  %v3701_v17 = vld [vmem:[%s5347_s2 + $0xe8] sm:$0xff] }
  0x1f   : > { %4309 = vmatprep.subr.bf16.mxu1 %v4615_v3  ;;  %v4364_v15 = vpack.c.bf16 %v3693_v11, %v3692_v9  ;;  %v3700_v16 = vld [vmem:[%s5347_s2 + $0xe0] sm:$0xff]  ;;  %v3687_v19 = vld [vmem:[%s5348_s3 + $0xb0] sm:$0xff]  ;;  %v3688_v20 = vld [vmem:[%s5348_s3 + $0xb8] sm:$0xff] }
  0x20   : > { %4305 = vmatpush3.bf16.msra.mxu0 %v4304_v14  ;;  %v3686_v14 = vld [vmem:[%s5348_s3 + $0xa8] sm:$0xff]  ;;  %v4373_v21 = vpack.c.bf16 %v3701_v17, %v3700_v16  ;;  %v3703_v23 = vld [vmem:[%s5347_s2 + $0xf8] sm:$0xff]  ;;  %v4358_v24 = vpack.c.bf16 %v3688_v20, %v3687_v19  ;;  %v3695_v25 = vld [vmem:[%s5348_s3 + $0xc0] sm:$0xff] }
  0x21   : > { %4312 = vmatprep.subr.bf16.mxu0 %v4615_v3  ;;  %v4355_v18 = vpack.c.bf16 %v3686_v14, %v3685_v13  ;;  %v3696_v26 = vld [vmem:[%s5348_s3 + $0xc8] sm:$0xff]  ;;  %v3697_v31 = vld [vmem:[%s5348_s3 + $0xd0] sm:$0xff]  ;;  %v3698_v32 = vld [vmem:[%s5348_s3 + $0xd8] sm:$0xff] }
  0x22   : > { %4311 = vmatpush3.bf16.msra.mxu1 %v4310_v37  ;;  %v1503_v29 = vld [vmem:[%s5346_s1 + $0x8] sm:$0xff]  ;;  %v4367_v30 = vpack.c.bf16 %v3696_v26, %v3695_v25  ;;  %v1505_v35 = vld [vmem:[%s5346_s1 + $0x18] sm:$0xff]  ;;  %v4370_v36 = vpack.c.bf16 %v3698_v32, %v3697_v31  ;;  %v3705_v37 = vld [vmem:[%s5348_s3 + $0xe0] sm:$0xff] }
  0x23   : > { %3964 = vmatmul.mubr.msk.f32.vlgmr.msra.gmra.mrb[2].mxu0 %vm270_vm1, %v4746_v10  ;;  %4318 = vmatprep.subr.bf16.mxu1 %v4615_v3  ;;  %v3706_v38 = vld [vmem:[%s5348_s3 + $0xe8] sm:$0xff]  ;;  %v3707_v41 = vld [vmem:[%s5348_s3 + $0xf0] sm:$0xff]  ;;  %v3708_v42 = vld [vmem:[%s5348_s3 + $0xf8] sm:$0xff] }
  0x24   : > { %4314 = vmatpush3.bf16.msra.mxu0 %v4313_v22  ;;  %3985 = vmatprep.mubr.msk.f32.mxu0 %vm4616_vm0, %v4617_v6  ;;  %v3702_v22 = vld [vmem:[%s5347_s2 + $0xf0] sm:$0xff]  ;;  %v3714_v19 = vld [vmem:[%s5346_s1 + $0x20] sm:$0xff]  ;;  %v3715_v20 = vld [vmem:[%s5346_s1 + $0x28] sm:$0xff] }
  0x25   : > { %4315 = vmatprep.subr.bf16.mxu0 %v4615_v3  ;;  %3975 = vmatmul.mubr.msk.f32.vlgmr.msra.gmra.mrb[2].mxu1 %vm270_vm1, %v4746_v10  ;;  %v4376_v27 = vpack.c.bf16 %v3703_v23, %v3702_v22  ;;  %v4391_v22 = vpack.c.bf16 %v3715_v20, %v3714_v19  ;;  %v3717_v23 = vld [vmem:[%s5346_s1 + $0x38] sm:$0xff] }
  0x26   : > { %4320 = vmatpush3.bf16.msra.mxu1 %v4319_v43  ;;  %3996 = vmatprep.mubr.msk.f32.mxu1 %vm4616_vm0, %v4617_v6  ;;  %v4382_v43 = vpack.c.bf16 %v3708_v42, %v3707_v41  ;;  %v3723_v41 = vld [vmem:[%s5346_s1 + $0x48] sm:$0xff]  ;;  %v3724_v42 = vld [vmem:[%s5346_s1 + $0x50] sm:$0xff] }
  0x27   : > { %4321 = vmatprep.subr.bf16.mxu1 %v4615_v3 }
  0x28   : > { %4317 = vmatpush3.bf16.msra.mxu0 %v4316_v28  ;;  %v1502_v28 = vld [vmem:[%s5346_s1] sm:$0xff] }
  0x29   : > { %4324 = vmatprep.subr.bf16.mxu0 %v4615_v3  ;;  %v4385_v33 = vpack.c.bf16 %v1503_v29, %v1502_v28 }
  0x2a   : > { %4323 = vmatpush3.bf16.msra.mxu1 %v4322_v49 }
  0x2b   : > { %3986 = vmatmul.mubr.msk.f32.vlgmr.msra.gmra.mrb[4].mxu0 %vm270_vm1, %v4746_v10  ;;  %4330 = vmatprep.subr.bf16.mxu1 %v4615_v3 }
  0x2c   : > { %4326 = vmatpush3.bf16.msra.mxu0 %v4325_v34  ;;  %4007 = vmatprep.mubr.msk.f32.mxu0 %vm4616_vm0, %v4617_v6  ;;  %v1504_v34 = vld [vmem:[%s5346_s1 + $0x10] sm:$0xff] }
  0x2d   : > { %4327 = vmatprep.subr.bf16.mxu0 %v4615_v3  ;;  %3997 = vmatmul.mubr.msk.f32.vlgmr.msra.gmra.mrb[4].mxu1 %vm270_vm1, %v4746_v10  ;;  %v4388_v39 = vpack.c.bf16 %v1505_v35, %v1504_v34 }
  0x2e   : > { %4332 = vmatpush3.bf16.msra.mxu1 %v4331_v55  ;;  %4018 = vmatprep.mubr.msk.f32.mxu1 %vm4616_vm0, %v4617_v6 }
  0x2f   : > { %4333 = vmatprep.subr.bf16.mxu1 %v4615_v3 }
  0x30   : > { %4329 = vmatpush3.bf16.msra.mxu0 %v4328_v40  ;;  %v4379_v40 = vpack.c.bf16 %v3706_v38, %v3705_v37 }
  0x31   : > { %4336 = vmatprep.subr.bf16.mxu0 %v4615_v3 }
  0x32   : > { %4335 = vmatpush3.bf16.msra.mxu1 %v4334_v61 }
  0x33   : > { %4008 = vmatmul.mubr.msk.f32.vlgmr.msra.gmra.mrb[6].mxu0 %vm270_vm1, %v4746_v10  ;;  %4342 = vmatprep.subr.bf16.mxu1 %v4615_v3 }
  0x34   : > { %4338 = vmatpush3.bf16.msra.mxu0 %v4337_v46  ;;  %4029 = vmatprep.mubr.msk.f32.mxu0 %vm4616_vm0, %v4617_v6 }
  0x35   : > { %4339 = vmatprep.subr.bf16.mxu0 %v4615_v3  ;;  %4019 = vmatmul.mubr.msk.f32.vlgmr.msra.gmra.mrb[6].mxu1 %vm270_vm1, %v4746_v10 }
  0x36   : > { %4344 = vmatpush3.bf16.msra.mxu1 %v4343_v4  ;;  %4040 = vmatprep.mubr.msk.f32.mxu1 %vm4616_vm0, %v4617_v6 }
  0x37   : > { %4345 = vmatprep.subr.bf16.mxu1 %v4615_v3 }
  0x38   : > { %4341 = vmatpush3.bf16.msra.mxu0 %v4340_v52 }
  0x39   : > { %4348 = vmatprep.subr.bf16.mxu0 %v4615_v3 }
  0x3a   : > { %4347 = vmatpush3.bf16.msra.mxu1 %v4346_v12 }
  0x3b   : > { %4030 = vmatmul.mubr.msk.f32.vlgmr.msra.gmra.mrb[8].mxu0 %vm270_vm1, %v4746_v10  ;;  %4354 = vmatprep.subr.bf16.mxu1 %v4615_v3 }
  0x3c   : > { %4350 = vmatpush3.bf16.msra.mxu0 %v4349_v58  ;;  %4051 = vmatprep.mubr.msk.f32.mxu0 %vm4616_vm0, %v4617_v6 }
  0x3d   : > { %4351 = vmatprep.subr.bf16.mxu0 %v4615_v3  ;;  %4041 = vmatmul.mubr.msk.f32.vlgmr.msra.gmra.mrb[8].mxu1 %vm270_vm1, %v4746_v10 }
  0x3e   : > { %4356 = vmatpush3.bf16.msra.mxu1 %v4355_v18  ;;  %4062 = vmatprep.mubr.msk.f32.mxu1 %vm4616_vm0, %v4617_v6 }
  0x3f   : > { %4357 = vmatprep.subr.bf16.mxu1 %v4615_v3 }
  0x40   : > { %4353 = vmatpush3.bf16.msra.mxu0 %v4352_v0 }
  0x41   : > { %4360 = vmatprep.subr.bf16.mxu0 %v4615_v3 }
  0x42   : > { %4359 = vmatpush3.bf16.msra.mxu1 %v4358_v24 }
  0x43   : > { %4052 = vmatmul.mubr.msk.f32.vlgmr.msra.gmra.mrb[10].mxu0 %vm270_vm1, %v4746_v10  ;;  %4366 = vmatprep.subr.bf16.mxu1 %v4615_v3 }
  0x44   : > { %4362 = vmatpush3.bf16.msra.mxu0 %v4361_v8  ;;  %4073 = vmatprep.mubr.msk.f32.mxu0 %vm4616_vm0, %v4617_v6 }
  0x45   : > { %4363 = vmatprep.subr.bf16.mxu0 %v4615_v3  ;;  %4063 = vmatmul.mubr.msk.f32.vlgmr.msra.gmra.mrb[10].mxu1 %vm270_vm1, %v4746_v10 }
  0x46   : > { %4368 = vmatpush3.bf16.msra.mxu1 %v4367_v30  ;;  %4084 = vmatprep.mubr.msk.f32.mxu1 %vm4616_vm0, %v4617_v6 }
  0x47   : > { %4369 = vmatprep.subr.bf16.mxu1 %v4615_v3 }
  0x48   : > { %4365 = vmatpush3.bf16.msra.mxu0 %v4364_v15 }
  0x49   : > { %4372 = vmatprep.subr.bf16.mxu0 %v4615_v3 }
  0x4a   : > { %4371 = vmatpush3.bf16.msra.mxu1 %v4370_v36 }
  0x4b   : > { %4074 = vmatmul.mubr.msk.f32.vlgmr.msra.gmra.mrb[12].mxu0 %vm270_vm1, %v4746_v10  ;;  %4378 = vmatprep.subr.bf16.mxu1 %v4615_v3 }
  0x4c   : > { %4374 = vmatpush3.bf16.msra.mxu0 %v4373_v21  ;;  %4095 = vmatprep.mubr.msk.f32.mxu0 %vm4616_vm0, %v4617_v6  ;;  %v3716_v21 = vld [vmem:[%s5346_s1 + $0x30] sm:$0xff] }
  0x4d   : > { %4375 = vmatprep.subr.bf16.mxu0 %v4615_v3  ;;  %4085 = vmatmul.mubr.msk.f32.vlgmr.msra.gmra.mrb[12].mxu1 %vm270_vm1, %v4746_v10  ;;  %v4394_v24 = vpack.c.bf16 %v3717_v23, %v3716_v21 }
  0x4e   : > { %4380 = vmatpush3.bf16.msra.mxu1 %v4379_v40  ;;  %4106 = vmatprep.mubr.msk.f32.mxu1 %vm4616_vm0, %v4617_v6  ;;  %v3722_v40 = vld [vmem:[%s5346_s1 + $0x40] sm:$0xff] }
  0x4f   : > { %4381 = vmatprep.subr.bf16.mxu1 %v4615_v3 }
  0x50   : > { %4377 = vmatpush3.bf16.msra.mxu0 %v4376_v27 }
  0x51   : > { %4384 = vmatprep.subr.bf16.mxu0 %v4615_v3 }
  0x52   : > { %4383 = vmatpush3.bf16.msra.mxu1 %v4382_v43  ;;  %v4397_v43 = vpack.c.bf16 %v3723_v41, %v3722_v40 }
  0x53   : > { %4096 = vmatmul.mubr.msk.f32.vlgmr.msra.gmra.mrb[14].mxu0 %vm270_vm1, %v4746_v10  ;;  %4120 = vmatprep.subr.mxu1 %v4617_v6 }
  0x54   : > { %4386 = vmatpush3.bf16.msra.mxu0 %v4385_v33  ;;  %4117 = vmatprep.mubr.msk.f32.mxu0 %vm4616_vm0, %v4617_v6 }
  0x55   : > { %4387 = vmatprep.subr.bf16.mxu0 %v4615_v3  ;;  %4107 = vmatmul.mubr.msk.f32.vlgmr.msra.gmra.mrb[14].mxu1 %vm270_vm1, %v4746_v10 }
  0x56   : > { %4122 = vmatprep.mubr.msk.f32.mxu1 %vm4616_vm0, %v4617_v6 }
  0x58   : > { %4389 = vmatpush3.bf16.msra.mxu0 %v4388_v39 }
  0x59   : > { %4390 = vmatprep.subr.bf16.mxu0 %v4615_v3 }
  0x5b   : > { %4118 = vmatmul.mubr.msk.f32.vlgmr.msra.gmra.mrb[16].mxu0 %vm270_vm1, %v4746_v10 }
  0x5c   : > { %4138 = vmatprep.mubr.msk.f32.mxu0 %vm4616_vm0, %v4617_v6  ;;  %4392 = vmatpush3.bf16.msra.mxu0 %v4391_v22 }
  0x5d   : > { %4393 = vmatprep.subr.bf16.mxu0 %v4615_v3 }
  0x60   : > { %4395 = vmatpush3.bf16.msra.mxu0 %v4394_v24 }
  0x61   : > { %4396 = vmatprep.subr.bf16.mxu0 %v4615_v3 }
  0x63   : > { %4139 = vmatmul.mubr.msk.f32.vlgmr.msra.gmra.mrb[18].mxu0 %vm270_vm1, %v4746_v10 }
  0x64   : > { %4159 = vmatprep.mubr.msk.f32.mxu0 %vm4616_vm0, %v4617_v6  ;;  %4398 = vmatpush3.bf16.msra.mxu0 %v4397_v43 }
  0x65   : > { %4399 = vmatprep.subr.bf16.mxu0 %v4615_v3 }
  0xee   : > { %v340_v44 = vpop.f32.mrb[0].mxu0 }
  0xef   : > { %345 = vst.msk [vmem:[#allocation2] sm:$0xff] %vm344_vm2, %v340_v44  ;;  %v3943_v45 = vpop.f32.mrb[1].mxu0  ;;  %v3725_v44 = vld [vmem:[%s5346_s1 + $0x58] sm:$0xff] }
  0xf0   : > { %v416_v49 = vpop.f32.mrb[0].mxu1  ;;  %v4400_v45 = vpack.c.bf16 %v3725_v44, %v3724_v42 }
  0xf1   : > { %420 = vst.msk [vmem:[#allocation3] sm:$0xff] %vm344_vm2, %v416_v49  ;;  %v3954_v50 = vpop.f32.mrb[1].mxu1 }
  0xf2   : > { %4401 = vmatpush3.bf16.msra.mxu0 %v4400_v45 }
  0xf3   : > { %4402 = vmatprep.subr.bf16.mxu0 %v4615_v3 }
  0xf5   : > { %4160 = vmatmul.mubr.msk.f32.vlgmr.msra.gmra.mrb[20].mxu0 %vm270_vm1, %v4746_v10 }
  0xf6   : > { %v492_v46 = vpop.f32.mrb[2].mxu0  ;;  %v1580_v47 = vld [vmem:[#allocation2] sm:$0xff]  ;;  %4180 = vmatprep.mubr.msk.f32.mxu0 %vm4616_vm0, %v4617_v6 }
  0xf7   : > { %497 = vst.msk [vmem:[#allocation2 + $0x8] sm:$0xff] %vm344_vm2, %v492_v46  ;;  %v3965_v48 = vpop.f32.mrb[3].mxu0  ;;  %4121 = vmatpush3.xpose.msk.msra.mxu1 %vm344_vm2, %v1580_v47 }
  0xf8   : > { %4125 = vmatprep.subr.mxu1 %v4617_v6  ;;  %v569_v53 = vpop.f32.mrb[2].mxu1  ;;  %v1670_v14 = vld [vmem:[#allocation3] sm:$0xff] }
  0xf9   : > { %574 = vst.msk [vmem:[#allocation3 + $0x8] sm:$0xff] %vm344_vm2, %v569_v53  ;;  %v3976_v54 = vpop.f32.mrb[3].mxu1 }
  0xfe   : > { %v646_v51 = vpop.f32.mrb[4].mxu0  ;;  %v1821_v38 = vld [vmem:[#allocation2 + $0x8] sm:$0xff] }
  0xff   : > { %651 = vst.msk [vmem:[#allocation2 + $0x10] sm:$0xff] %vm344_vm2, %v646_v51  ;;  %v3987_v52 = vpop.f32.mrb[5].mxu0 }
 0x100   : > { %v723_v57 = vpop.f32.mrb[4].mxu1  ;;  %v1910_v39 = vld [vmem:[#allocation3 + $0x8] sm:$0xff] }
 0x101   : > { %728 = vst.msk [vmem:[#allocation3 + $0x10] sm:$0xff] %vm344_vm2, %v723_v57  ;;  %v3998_v58 = vpop.f32.mrb[5].mxu1 }
 0x106   : > { %v800_v55 = vpop.f32.mrb[6].mxu0 }
 0x107   : > { %805 = vst.msk [vmem:[#allocation2 + $0x18] sm:$0xff] %vm344_vm2, %v800_v55  ;;  %v4009_v56 = vpop.f32.mrb[7].mxu0 }
 0x108   : > { %v877_v61 = vpop.f32.mrb[6].mxu1 }
 0x109   : > { %882 = vst.msk [vmem:[#allocation3 + $0x18] sm:$0xff] %vm344_vm2, %v877_v61  ;;  %v4020_v62 = vpop.f32.mrb[7].mxu1  ;;  %v2066_v61 = vld [vmem:[#allocation2 + $0x10] sm:$0xff] }
 0x10a   : > { %v2155_v62 = vld [vmem:[#allocation3 + $0x10] sm:$0xff] }
 0x10e   : > { %v954_v59 = vpop.f32.mrb[8].mxu0  ;;  %v2311_v23 = vld [vmem:[#allocation2 + $0x18] sm:$0xff] }
 0x10f   : > { %959 = vst.msk [vmem:[#allocation2 + $0x20] sm:$0xff] %vm344_vm2, %v954_v59  ;;  %v4031_v60 = vpop.f32.mrb[9].mxu0 }
 0x110   : > { %v1031_v1 = vpop.f32.mrb[8].mxu1  ;;  %v2400_v24 = vld [vmem:[#allocation3 + $0x18] sm:$0xff] }
 0x111   : > { %1036 = vst.msk [vmem:[#allocation3 + $0x20] sm:$0xff] %vm344_vm2, %v1031_v1  ;;  %v4042_v2 = vpop.f32.mrb[9].mxu1  ;;  %v3732_v1 = vld [vmem:[%s5346_s1 + $0x70] sm:$0xff] }
 0x116   : > { %v1108_v63 = vpop.f32.mrb[10].mxu0 }
 0x117   : > { %1113 = vst.msk [vmem:[#allocation2 + $0x28] sm:$0xff] %vm344_vm2, %v1108_v63  ;;  %v4053_v0 = vpop.f32.mrb[11].mxu0  ;;  %v3730_v63 = vld [vmem:[%s5346_s1 + $0x60] sm:$0xff] }
 0x118   : > { %v1185_v7 = vpop.f32.mrb[10].mxu1  ;;  %v3731_v0 = vld [vmem:[%s5346_s1 + $0x68] sm:$0xff] }
 0x119   : > { %1190 = vst.msk [vmem:[#allocation3 + $0x28] sm:$0xff] %vm344_vm2, %v1185_v7  ;;  %v4064_v8 = vpop.f32.mrb[11].mxu1  ;;  %v4403_v2 = vpack.c.bf16 %v3731_v0, %v3730_v63 }
 0x11b   : > { %4404 = vmatpush3.bf16.msra.mxu0 %v4403_v2 }
 0x11c   : > { %4405 = vmatprep.subr.bf16.mxu0 %v4615_v3 }
 0x11e   : > { %v1262_v4 = vpop.f32.mrb[12].mxu0 }
 0x11f   : > { %1267 = vst.msk [vmem:[#allocation2 + $0x30] sm:$0xff] %vm344_vm2, %v1262_v4  ;;  %v4075_v5 = vpop.f32.mrb[13].mxu0  ;;  %v3733_v4 = vld [vmem:[%s5346_s1 + $0x78] sm:$0xff] }
 0x120   : > { %v1339_v12 = vpop.f32.mrb[12].mxu1  ;;  %v4406_v5 = vpack.c.bf16 %v3733_v4, %v3732_v1 }
 0x121   : > { %1344 = vst.msk [vmem:[#allocation3 + $0x30] sm:$0xff] %vm344_vm2, %v1339_v12  ;;  %v4086_v13 = vpop.f32.mrb[13].mxu1 }
 0x122   : > { %4407 = vmatpush3.bf16.msra.mxu0 %v4406_v5 }
 0x123   : > { %4408 = vmatprep.subr.bf16.mxu0 %v4615_v3 }
 0x125   : > { %4181 = vmatmul.mubr.msk.f32.vlgmr.msra.gmra.mrb[22].mxu0 %vm270_vm1, %v4746_v10 }
 0x126   : > { %v1416_v9 = vpop.f32.mrb[14].mxu0  ;;  %4201 = vmatprep.mubr.msk.f32.mxu0 %vm4616_vm0, %v4617_v6 }
 0x127   : > { %1421 = vst.msk [vmem:[#allocation2 + $0x38] sm:$0xff] %vm344_vm2, %v1416_v9  ;;  %v4097_v11 = vpop.f32.mrb[15].mxu0 }
 0x128   : > { %v1493_v17 = vpop.f32.mrb[14].mxu1 }
 0x129   : > { %1498 = vst.msk [vmem:[#allocation3 + $0x38] sm:$0xff] %vm344_vm2, %v1493_v17  ;;  %v4108_v18 = vpop.f32.mrb[15].mxu1 }
 0x12e   : > { %v1576_v15 = vpop.f32.mrb[16].mxu0 }
 0x12f   : > { %v4119_v16 = vpop.f32.mrb[17].mxu0  ;;  %4123 = vmatmul.mubr.msk.f32.vlgmr.msra.gmra.mrb[16].mxu1 %vm344_vm2, %v1576_v15 }
 0x130   : > { %4126 = vmatpush3.msra.mxu1 %v1670_v14  ;;  %4127 = vmatprep.mubr.msk.f32.mxu1 %vm4616_vm0, %v4617_v6 }
 0x131   : > { %4141 = vmatprep.subr.mxu1 %v4617_v6 }
 0x136   : > { %v1816_v33 = vpop.f32.mrb[18].mxu0 }
 0x137   : > { %v4140_v34 = vpop.f32.mrb[19].mxu0 }
 0x1c8   : > { %v2061_v56 = vpop.f32.mrb[20].mxu0 }
 0x1c9   : > { %v4161_v57 = vpop.f32.mrb[21].mxu0 }
 0x1f8   : > { %v2306_v18 = vpop.f32.mrb[22].mxu0 }
 0x1f9   : > { %v4182_v19 = vpop.f32.mrb[23].mxu0 }
 0x202   : > { %v1654_v25 = vpop.f32.mrb[16].mxu1 }
 0x203   : > { %v4124_v26 = vpop.f32.mrb[17].mxu1  ;;  %v1659_v27 = vsel %vm1658_vm3, %v1654_v25, -inf }
 0x204   : > { %1660 = vmax.xlane.f32.xlu0 %v1659_v27  ;;  %v3739_v26 = vld [vmem:[%s5346_s1 + $0x88] sm:$0xff]  ;;  %v3740_v27 = vld [vmem:[%s5346_s1 + $0x90] sm:$0xff] }
 0x291   : > { %v1661_v28 = vpop.xlane.xlu0 %1660 }
 0x292   : > { %v1662_v29 = vsub.f32 %v1654_v25, %v1661_v28  ;;  %v3738_v25 = vld [vmem:[%s5346_s1 + $0x80] sm:$0xff] }
 0x293   : > { %v4409_v28 = vpack.c.bf16 %v3739_v26, %v3738_v25 }
 0x294   : > { %v1663_v30 = vmul.f32 1.442695, %v1662_v29  ;;  %v3741_v29 = vld [vmem:[%s5346_s1 + $0x98] sm:$0xff] }
 0x295   : > { %4410 = vmatpush3.bf16.msra.mxu0 %v4409_v28 }
 0x296   : > { %4503 = vpow2.f32 %v1663_v30  ;;  %v4412_v30 = vpack.c.bf16 %v3741_v29, %v3740_v27  ;;  %4411 = vmatprep.subr.bf16.mxu0 %v4615_v3 }
 0x299   : > { %4413 = vmatpush3.bf16.msra.mxu0 %v4412_v30 }
 0x29a   : > { %4414 = vmatprep.subr.bf16.mxu0 %v4615_v3 }
 0x29c   : > { %4202 = vmatmul.mubr.msk.f32.vlgmr.msra.gmra.mrb[24].mxu0 %vm270_vm1, %v4746_v10 }
 0x29d   : > { %4222 = vmatprep.mubr.msk.f32.mxu0 %vm4616_vm0, %v4617_v6 }
 0x2a0   : > { %v4504_v31 = vpop.eup %4503 }
 0x2a1   : > { %v1665_v32 = vsel %vm1658_vm3, %v4504_v31, 0.0 }
 0x2a2   : > { %1666 = vadd.xlane.f32.xlu0 %v1665_v32 }
 0x32f   : > { %v1667_v35 = vpop.xlane.xlu0 %1666 }
 0x330   : > { %4505 = vrcp.f32 %v1667_v35 }
 0x33a   : > { %v4506_v36 = vpop.eup %4505 }
 0x33b   : > { %v1669_v37 = vmul.f32 %v4506_v36, %v4504_v31 }
 0x33d   : > { %4128 = vmatmul.mubr.msk.f32.vlgmr.msra.gmra.mrb[18].mxu1 %vm1658_vm3, %v1669_v37 }
 0x33e   : > { %4142 = vmatpush3.xpose.msk.msra.mxu1 %vm344_vm2, %v1821_v38  ;;  %4143 = vmatprep.mubr.msk.f32.mxu1 %vm4616_vm0, %v4617_v6 }
 0x33f   : > { %4146 = vmatprep.subr.mxu1 %v4617_v6 }
 0x341   : > { %4144 = vmatmul.mubr.msk.f32.vlgmr.msra.gmra.mrb[20].mxu1 %vm344_vm2, %v1816_v33 }
 0x342   : > { %4147 = vmatpush3.msra.mxu1 %v1910_v39  ;;  %4148 = vmatprep.mubr.msk.f32.mxu1 %vm4616_vm0, %v4617_v6 }
 0x343   : > { %4162 = vmatprep.subr.mxu1 %v4617_v6 }
 0x36f   : > { %v2551_v41 = vpop.f32.mrb[24].mxu0 }
 0x370   : > { %v4203_v42 = vpop.f32.mrb[25].mxu0 }
 0x410   : > { %v1740_v46 = vpop.f32.mrb[18].mxu1 }
 0x411   : > { %1744 = vst.msk [vmem:[#allocation4] sm:$0xff] %vm344_vm2, %v1740_v46  ;;  %v4129_v47 = vpop.f32.mrb[19].mxu1  ;;  %v2556_v46 = vld [vmem:[#allocation2 + $0x20] sm:$0xff] }
 0x412   : > { %v2645_v47 = vld [vmem:[#allocation3 + $0x20] sm:$0xff] }
 0x414   : > { %v1894_v48 = vpop.f32.mrb[20].mxu1 }
 0x415   : > { %v4145_v49 = vpop.f32.mrb[21].mxu1  ;;  %v1898_v50 = vsel %vm1658_vm3, %v1894_v48, -inf }
 0x416   : > { %1899 = vmax.xlane.f32.xlu1 %v1898_v50  ;;  %v3747_v49 = vld [vmem:[%s5346_s1 + $0xa8] sm:$0xff]  ;;  %v3748_v50 = vld [vmem:[%s5346_s1 + $0xb0] sm:$0xff] }
 0x4a3   : > { %v1900_v51 = vpop.xlane.xlu1 %1899 }
 0x4a4   : > { %v1901_v52 = vsub.f32 %v1894_v48, %v1900_v51  ;;  %v3746_v48 = vld [vmem:[%s5346_s1 + $0xa0] sm:$0xff] }
 0x4a5   : > { %v4415_v51 = vpack.c.bf16 %v3747_v49, %v3746_v48 }
 0x4a6   : > { %v1902_v53 = vmul.f32 1.442695, %v1901_v52  ;;  %v3749_v52 = vld [vmem:[%s5346_s1 + $0xb8] sm:$0xff] }
 0x4a7   : > { %4416 = vmatpush3.bf16.msra.mxu0 %v4415_v51 }
 0x4a8   : > { %4507 = vpow2.f32 %v1902_v53  ;;  %v4418_v53 = vpack.c.bf16 %v3749_v52, %v3748_v50  ;;  %4417 = vmatprep.subr.bf16.mxu0 %v4615_v3 }
 0x4ab   : > { %4419 = vmatpush3.bf16.msra.mxu0 %v4418_v53 }
 0x4ac   : > { %4420 = vmatprep.subr.bf16.mxu0 %v4615_v3 }
 0x4ae   : > { %4223 = vmatmul.mubr.msk.f32.vlgmr.msra.gmra.mrb[26].mxu0 %vm270_vm1, %v4746_v10 }
 0x4af   : > { %4243 = vmatprep.mubr.msk.f32.mxu0 %vm4616_vm0, %v4617_v6 }
 0x4b2   : > { %v4508_v54 = vpop.eup %4507 }
 0x4b3   : > { %v1904_v55 = vsel %vm1658_vm3, %v4508_v54, 0.0 }
 0x4b4   : > { %1905 = vadd.xlane.f32.xlu1 %v1904_v55 }
 0x541   : > { %v1906_v58 = vpop.xlane.xlu1 %1905 }
 0x542   : > { %4509 = vrcp.f32 %v1906_v58 }
 0x54c   : > { %v4510_v59 = vpop.eup %4509 }
 0x54d   : > { %v1908_v60 = vmul.f32 %v4510_v59, %v4508_v54 }
 0x54f   : > { %4149 = vmatmul.mubr.msk.f32.vlgmr.msra.gmra.mrb[22].mxu1 %vm1658_vm3, %v1908_v60 }
 0x550   : > { %4163 = vmatpush3.xpose.msk.msra.mxu1 %vm344_vm2, %v2066_v61  ;;  %4164 = vmatprep.mubr.msk.f32.mxu1 %vm4616_vm0, %v4617_v6 }
 0x551   : > { %4167 = vmatprep.subr.mxu1 %v4617_v6 }
 0x553   : > { %4165 = vmatmul.mubr.msk.f32.vlgmr.msra.gmra.mrb[24].mxu1 %vm344_vm2, %v2061_v56 }
 0x554   : > { %4168 = vmatpush3.msra.mxu1 %v2155_v62  ;;  %4169 = vmatprep.mubr.msk.f32.mxu1 %vm4616_vm0, %v4617_v6 }
 0x555   : > { %4183 = vmatprep.subr.mxu1 %v4617_v6 }
 0x581   : > { %v2796_v0 = vpop.f32.mrb[26].mxu0 }
 0x582   : > { %v4224_v1 = vpop.f32.mrb[27].mxu0 }
 0x622   : > { %v5134_v7 = vpop.f32.mrb[22].mxu1 }
 0x623   : > { %v4150_v8 = vpop.f32.mrb[23].mxu1 }
 0x624   : > { %v2801_v8 = vld [vmem:[#allocation2 + $0x28] sm:$0xff] }
 0x626   : > { %v2139_v9 = vpop.f32.mrb[24].mxu1 }
 0x627   : > { %v4166_v11 = vpop.f32.mrb[25].mxu1  ;;  %v2143_v12 = vsel %vm1658_vm3, %v2139_v9, -inf }
 0x628   : > { %2144 = vmax.xlane.f32.xlu0 %v2143_v12  ;;  %v3754_v11 = vld [vmem:[%s5346_s1 + $0xc0] sm:$0xff]  ;;  %v3755_v12 = vld [vmem:[%s5346_s1 + $0xc8] sm:$0xff] }
 0x6b5   : > { %v2145_v13 = vpop.xlane.xlu0 %2144 }
 0x6b6   : > { %v2146_v14 = vsub.f32 %v2139_v9, %v2145_v13  ;;  %v2890_v9 = vld [vmem:[#allocation3 + $0x28] sm:$0xff]  ;;  %v3756_v13 = vld [vmem:[%s5346_s1 + $0xd0] sm:$0xff] }
 0x6b8   : > { %v2147_v15 = vmul.f32 1.442695, %v2146_v14  ;;  %v4421_v14 = vpack.c.bf16 %v3755_v12, %v3754_v11 }
 0x6ba   : > { %4511 = vpow2.f32 %v2147_v15  ;;  %v3757_v15 = vld [vmem:[%s5346_s1 + $0xd8] sm:$0xff]  ;;  %4422 = vmatpush3.bf16.msra.mxu0 %v4421_v14  ;;  %v3462_v14 = vld [vmem:[%s5349_s4 + $0x8] sm:$0xff] }
 0x6bb   : > { %4423 = vmatprep.subr.bf16.mxu0 %v4615_v3 }
 0x6c4   : > { %v4512_v16 = vpop.eup %4511 }
 0x6c5   : > { %v2149_v17 = vsel %vm1658_vm3, %v4512_v16, 0.0 }
 0x6c6   : > { %2150 = vadd.xlane.f32.xlu1 %v2149_v17 }
 0x753   : > { %v2151_v20 = vpop.xlane.xlu1 %2150 }
 0x754   : > { %4513 = vrcp.f32 %v2151_v20 }
 0x75e   : > { %v4514_v21 = vpop.eup %4513 }
 0x75f   : > { %v2153_v22 = vmul.f32 %v4514_v21, %v4512_v16  ;;  %v4424_v16 = vpack.c.bf16 %v3757_v15, %v3756_v13  ;;  %v3461_v13 = vld [vmem:[%s5349_s4] sm:$0xff] }
 0x760   : > { %v4433_v15 = vpack.c.bf16 %v3462_v14, %v3461_v13 }
 0x761   : > { %4170 = vmatmul.mubr.msk.f32.vlgmr.msra.gmra.mrb[26].mxu1 %vm1658_vm3, %v2153_v22  ;;  %4425 = vmatpush3.bf16.msra.mxu0 %v4424_v16  ;;  %v3463_v16 = vld [vmem:[%s5349_s4 + $0x10] sm:$0xff] }
 0x762   : > { %4184 = vmatpush3.xpose.msk.msra.mxu1 %vm344_vm2, %v2311_v23  ;;  %4185 = vmatprep.mubr.msk.f32.mxu1 %vm4616_vm0, %v4617_v6 }
 0x763   : > { %4188 = vmatprep.subr.mxu1 %v4617_v6  ;;  %4426 = vmatprep.subr.bf16.mxu0 %v4615_v3 }
 0x764   : > { %4244 = vmatmul.mubr.msk.f32.vlgmr.msra.gmra.mrb[28].mxu0 %vm270_vm1, %v4746_v10 }
 0x765   : > { %4186 = vmatmul.mubr.msk.f32.vlgmr.msra.gmra.mrb[28].mxu1 %vm344_vm2, %v2306_v18  ;;  %4264 = vmatprep.mubr.msk.f32.mxu0 %vm4616_vm0, %v4617_v6 }
 0x766   : > { %4189 = vmatpush3.msra.mxu1 %v2400_v24  ;;  %4190 = vmatprep.mubr.msk.f32.mxu1 %vm4616_vm0, %v4617_v6 }
 0x767   : > { %4204 = vmatprep.subr.mxu1 %v4617_v6 }
 0x834   : > { %v5165_v31 = vpop.f32.mrb[26].mxu1 }
 0x835   : > { %v4171_v32 = vpop.f32.mrb[27].mxu1 }
 0x837   : > { %v3041_v27 = vpop.f32.mrb[28].mxu0 }
 0x838   : > { %v2384_v33 = vpop.f32.mrb[28].mxu1  ;;  %v4245_v28 = vpop.f32.mrb[29].mxu0 }
 0x839   : > { %v4187_v34 = vpop.f32.mrb[29].mxu1  ;;  %v2388_v35 = vsel %vm1658_vm3, %v2384_v33, -inf }
 0x83a   : > { %2389 = vmax.xlane.f32.xlu0 %v2388_v35  ;;  %v3135_v34 = vld [vmem:[#allocation3 + $0x30] sm:$0xff]  ;;  %v3762_v35 = vld [vmem:[%s5346_s1 + $0xe0] sm:$0xff] }
 0x8c7   : > { %v2390_v36 = vpop.xlane.xlu0 %2389 }
 0x8c8   : > { %v2391_v37 = vsub.f32 %v2384_v33, %v2390_v36  ;;  %v3046_v33 = vld [vmem:[#allocation2 + $0x30] sm:$0xff]  ;;  %v3763_v36 = vld [vmem:[%s5346_s1 + $0xe8] sm:$0xff] }
 0x8ca   : > { %v2392_v38 = vmul.f32 1.442695, %v2391_v37  ;;  %v3764_v37 = vld [vmem:[%s5346_s1 + $0xf0] sm:$0xff] }
 0x8cc   : > { %4515 = vpow2.f32 %v2392_v38  ;;  %v4427_v38 = vpack.c.bf16 %v3763_v36, %v3762_v35 }
 0x8ce   : > { %4428 = vmatpush3.bf16.msra.mxu0 %v4427_v38 }
 0x8cf   : > { %4429 = vmatprep.subr.bf16.mxu0 %v4615_v3 }
 0x8d6   : > { %v4516_v39 = vpop.eup %4515 }
 0x8d7   : > { %v2394_v40 = vsel %vm1658_vm3, %v4516_v39, 0.0 }
 0x8d8   : > { %2395 = vadd.xlane.f32.xlu1 %v2394_v40 }
 0x965   : > { %v2396_v43 = vpop.xlane.xlu1 %2395 }
 0x966   : > { %4517 = vrcp.f32 %v2396_v43 }
 0x970   : > { %v4518_v44 = vpop.eup %4517 }
 0x971   : > { %v2398_v45 = vmul.f32 %v4518_v44, %v4516_v39  ;;  %v3765_v39 = vld [vmem:[%s5346_s1 + $0xf8] sm:$0xff] }
 0x972   : > { %v4430_v40 = vpack.c.bf16 %v3765_v39, %v3764_v37 }
 0x973   : > { %4191 = vmatmul.mubr.msk.f32.vlgmr.msra.gmra.mrb[30].mxu1 %vm1658_vm3, %v2398_v45 }
 0x974   : > { %4205 = vmatpush3.xpose.msk.msra.mxu1 %vm344_vm2, %v2556_v46  ;;  %4206 = vmatprep.mubr.msk.f32.mxu1 %vm4616_vm0, %v4617_v6 }
 0x975   : > { %4209 = vmatprep.subr.mxu1 %v4617_v6  ;;  %4431 = vmatpush3.bf16.msra.mxu0 %v4430_v40 }
 0x976   : > { %4432 = vmatprep.subr.bf16.mxu0 %v4615_v3 }
 0x977   : > { %4207 = vmatmul.mubr.msk.f32.vlgmr.msra.gmra.mrb[32].mxu1 %vm344_vm2, %v2551_v41 }
 0x978   : > { %4210 = vmatpush3.msra.mxu1 %v2645_v47  ;;  %4211 = vmatprep.mubr.msk.f32.mxu1 %vm4616_vm0, %v4617_v6 }
 0x979   : > { %4225 = vmatprep.subr.mxu1 %v4617_v6  ;;  %4265 = vmatmul.mubr.msk.f32.vlgmr.msra.gmra.mrb[30].mxu0 %vm270_vm1, %v4746_v10 }
 0x97a   : > { %4285 = vmatprep.mubr.msk.f32.mxu0 %vm4616_vm0, %v4617_v6  ;;  %4434 = vmatpush3.bf16.msra.mxu0 %v4433_v15 }
 0x97b   : > { %4435 = vmatprep.subr.bf16.mxu0 %v4615_v3 }
 0xa46   : > { %v5196_v54 = vpop.f32.mrb[30].mxu1 }
 0xa47   : > { %v4192_v55 = vpop.f32.mrb[31].mxu1 }
 0xa4a   : > { %v2629_v56 = vpop.f32.mrb[32].mxu1 }
 0xa4b   : > { %v4208_v57 = vpop.f32.mrb[33].mxu1  ;;  %v2633_v58 = vsel %vm1658_vm3, %v2629_v56, -inf }
 0xa4c   : > { %2634 = vmax.xlane.f32.xlu0 %v2633_v58  ;;  %v3286_v51 = vpop.f32.mrb[30].mxu0  ;;  %v3380_v57 = vld [vmem:[#allocation3 + $0x38] sm:$0xff] }
 0xa4d   : > { %v4266_v10 = vpop.f32.mrb[31].mxu0 }
 0xad9   : > { %v2635_v59 = vpop.xlane.xlu0 %2634 }
 0xada   : > { %v2636_v60 = vsub.f32 %v2629_v56, %v2635_v59  ;;  %v3291_v56 = vld [vmem:[#allocation2 + $0x38] sm:$0xff] }
 0xadc   : > { %v2637_v61 = vmul.f32 1.442695, %v2636_v60 }
 0xade   : > { %4519 = vpow2.f32 %v2637_v61 }
 0xae8   : > { %v4520_v62 = vpop.eup %4519 }
 0xae9   : > { %v2639_v63 = vsel %vm1658_vm3, %v4520_v62, 0.0 }
 0xaea   : > { %2640 = vadd.xlane.f32.xlu1 %v2639_v63 }
 0xb77   : > { %v2641_v2 = vpop.xlane.xlu1 %2640 }
 0xb78   : > { %4521 = vrcp.f32 %v2641_v2 }
 0xb82   : > { %v4522_v4 = vpop.eup %4521 }
 0xb83   : > { %v2643_v5 = vmul.f32 %v4522_v4, %v4520_v62 }
 0xb85   : > { %4212 = vmatmul.mubr.msk.f32.vlgmr.msra.gmra.mrb[34].mxu1 %vm1658_vm3, %v2643_v5 }
 0xb86   : > { %4226 = vmatpush3.xpose.msk.msra.mxu1 %vm344_vm2, %v2801_v8  ;;  %4227 = vmatprep.mubr.msk.f32.mxu1 %vm4616_vm0, %v4617_v6 }
 0xb87   : > { %4230 = vmatprep.subr.mxu1 %v4617_v6 }
 0xb89   : > { %4228 = vmatmul.mubr.msk.f32.vlgmr.msra.gmra.mrb[36].mxu1 %vm344_vm2, %v2796_v0 }
 0xb8a   : > { %4231 = vmatpush3.msra.mxu1 %v2890_v9  ;;  %4232 = vmatprep.mubr.msk.f32.mxu1 %vm4616_vm0, %v4617_v6 }
 0xb8b   : > { %4246 = vmatprep.subr.mxu1 %v4617_v6 }
 0xc58   : > { %v5227_v17 = vpop.f32.mrb[34].mxu1 }
 0xc59   : > { %v4213_v18 = vpop.f32.mrb[35].mxu1 }
 0xc5c   : > { %v2874_v19 = vpop.f32.mrb[36].mxu1 }
 0xc5d   : > { %v4229_v20 = vpop.f32.mrb[37].mxu1  ;;  %v2878_v21 = vsel %vm1658_vm3, %v2874_v19, -inf }
 0xc5e   : > { %2879 = vmax.xlane.f32.xlu0 %v2878_v21 }
 0xceb   : > { %v2880_v22 = vpop.xlane.xlu0 %2879 }
 0xcec   : > { %v2881_v23 = vsub.f32 %v2874_v19, %v2880_v22 }
 0xcee   : > { %v2882_v24 = vmul.f32 1.442695, %v2881_v23  ;;  %v3770_v23 = vld [vmem:[%s5350_s5] ss:$0 sm:$0xff] }
 0xcf0   : > { %4523 = vpow2.f32 %v2882_v24 }
 0xcfa   : > { %v4524_v25 = vpop.eup %4523 }
 0xcfb   : > { %v2884_v26 = vsel %vm1658_vm3, %v4524_v25, 0.0 }
 0xcfc   : > { %2885 = vadd.xlane.f32.xlu1 %v2884_v26 }
 0xd89   : > { %v2886_v29 = vpop.xlane.xlu1 %2885 }
 0xd8a   : > { %4525 = vrcp.f32 %v2886_v29 }
 0xd94   : > { %v4526_v30 = vpop.eup %4525 }
 0xd95   : > { %v2888_v32 = vmul.f32 %v4526_v30, %v4524_v25 }
 0xd97   : > { %4233 = vmatmul.mubr.msk.f32.vlgmr.msra.gmra.mrb[38].mxu1 %vm1658_vm3, %v2888_v32 }
 0xd98   : > { %4247 = vmatpush3.xpose.msk.msra.mxu1 %vm344_vm2, %v3046_v33  ;;  %4248 = vmatprep.mubr.msk.f32.mxu1 %vm4616_vm0, %v4617_v6 }
 0xd99   : > { %4251 = vmatprep.subr.mxu1 %v4617_v6 }
 0xd9b   : > { %4249 = vmatmul.mubr.msk.f32.vlgmr.msra.gmra.mrb[40].mxu1 %vm344_vm2, %v3041_v27 }
 0xd9c   : > { %4252 = vmatpush3.msra.mxu1 %v3135_v34  ;;  %4253 = vmatprep.mubr.msk.f32.mxu1 %vm4616_vm0, %v4617_v6 }
 0xd9d   : > { %4267 = vmatprep.subr.mxu1 %v4617_v6 }
 0xe6a   : > { %v2960_v41 = vpop.f32.mrb[38].mxu1 }
 0xe6b   : > { %v4234_v42 = vpop.f32.mrb[39].mxu1 }
 0xe6e   : > { %v3119_v43 = vpop.f32.mrb[40].mxu1 }
 0xe6f   : > { %v4250_v44 = vpop.f32.mrb[41].mxu1  ;;  %v3123_v45 = vsel %vm1658_vm3, %v3119_v43, -inf }
 0xe70   : > { %3124 = vmax.xlane.f32.xlu0 %v3123_v45 }
 0xefd   : > { %v3125_v46 = vpop.xlane.xlu0 %3124 }
 0xefe   : > { %v3126_v47 = vsub.f32 %v3119_v43, %v3125_v46 }
 0xf00   : > { %v3127_v48 = vmul.f32 1.442695, %v3126_v47 }
 0xf02   : > { %4527 = vpow2.f32 %v3127_v48 }
 0xf0c   : > { %v4528_v49 = vpop.eup %4527 }
 0xf0d   : > { %v3129_v50 = vsel %vm1658_vm3, %v4528_v49, 0.0 }
 0xf0e   : > { %3130 = vadd.xlane.f32.xlu1 %v3129_v50 }
 0xf9b   : > { %v3131_v52 = vpop.xlane.xlu1 %3130 }
 0xf9c   : > { %4529 = vrcp.f32 %v3131_v52 }
 0xfa6   : > { %v4530_v53 = vpop.eup %4529 }
 0xfa7   : > { %v3133_v55 = vmul.f32 %v4530_v53, %v4528_v49 }
 0xfa9   : > { %4254 = vmatmul.mubr.msk.f32.vlgmr.msra.gmra.mrb[42].mxu1 %vm1658_vm3, %v3133_v55 }
 0xfaa   : > { %4268 = vmatpush3.xpose.msk.msra.mxu1 %vm344_vm2, %v3291_v56  ;;  %4269 = vmatprep.mubr.msk.f32.mxu1 %vm4616_vm0, %v4617_v6 }
 0xfab   : > { %4272 = vmatprep.subr.mxu1 %v4617_v6 }
 0xfad   : > { %4270 = vmatmul.mubr.msk.f32.vlgmr.msra.gmra.mrb[44].mxu1 %vm344_vm2, %v3286_v51 }
 0xfae   : > { %4273 = vmatpush3.msra.mxu1 %v3380_v57  ;;  %4274 = vmatprep.mubr.msk.f32.mxu1 %vm4616_vm0, %v4617_v6 }
0x107c   : > { %v3205_v58 = vpop.f32.mrb[42].mxu1 }
0x107d   : > { %v4255_v59 = vpop.f32.mrb[43].mxu1 }
0x1080   : > { %v3364_v60 = vpop.f32.mrb[44].mxu1 }
0x1081   : > { %v4271_v61 = vpop.f32.mrb[45].mxu1  ;;  %v3368_v62 = vsel %vm1658_vm3, %v3364_v60, -inf }
0x1082   : > { %3369 = vmax.xlane.f32.xlu0 %v3368_v62 }
0x1098   : > { %1985 = vrot.lane.b32.xlu0 %v5134_v7, %s4618_s12  ;;  %s4624_s12 = smov 28  }
0x109c   : > { %2965 = vrot.lane.b32.xlu0 %v2960_v41, %s4619_s13  ;;  %s254_s13 = sand.u32 1, %s4597_s22  }
0x109d   : > { %s3547_s30 = scalar_lea.sflag [#allocation6], %s254_s13 }
0x110f   : > { %v3370_v63 = vpop.xlane.xlu0 %3369 }
0x1110   : > { %v3371_v0 = vsub.f32 %v3364_v60, %v3370_v63 }
0x1112   : > { %v3372_v1 = vmul.f32 1.442695, %v3371_v0 }
0x1113   : > { %v1986_v2 = vpop.permute.xlu0 %1985 }
0x1114   : > { %4531 = vpow2.f32 %v3372_v1  ;;  %1989 = vst.msk [vmem:[#allocation4] sm:$0xff] %vm1988_vm4, %v1986_v2 }
0x1117   : > { %v2966_v12 = vpop.permute.xlu0 %2965 }
0x111e   : > { %v4532_v6 = vpop.eup %4531 }
0x111f   : > { %v3374_v4 = vsel %vm1658_vm3, %v4532_v6, 0.0 }
0x1120   : > { %3375 = vadd.xlane.f32.xlu1 %v3374_v4 }
0x1131   : > { %2230 = vrot.lane.b32.xlu1 %v5165_v31, %s4620_s14  ;;  %s3636_s14 = sshll.u32 %s254_s13, 3 }
0x1132   : > { %s256_s18 = scalar_lea.vmem [#allocation5], %s3636_s14 }
0x1133   : > { %s3561_s19 = sshll.u32 %s256_s18, 4  ;;  %s5299_s19 = int_to_ptr.vmem [resolvable:$true] %s3561_s19 }
0x1134   : > { %s4535_s8 = scalar_lea.vmem %s5299_s19, 128 }
0x1135   : > { %2475 = vrot.lane.b32.xlu1 %v5196_v54, %s4621_s15  ;;  %p4536_p12 = scmp.ne.s32.totalorder %s5299_s19, %s4535_s8 }
0x1137   : > { %p4537_p13 = pnand %p4536_p12, %p4701_p4 }
0x1139   : > { %2720 = vrot.lane.b32.xlu1 %v5227_v17, %s4622_s16  ;;  %v3464_v17 = vld [vmem:[%s5349_s4 + $0x18] sm:$0xff]  ;;  %p4538_p0 = pneg %p4537_p13 }
0x113a   : > { %v4436_v18 = vpack.c.bf16 %v3464_v17, %v3463_v16 }
0x113c   : > { %4437 = vmatpush3.bf16.msra.mxu0 %v4436_v18 }
0x113d   : > { %3210 = vrot.lane.b32.xlu1 %v3205_v58, %s4623_s17  ;;  %s3773_s17 = sshll.u32 %s4605_s24, 7  ;;  %s4625_s24 = smov [#allocation5]  }
0x113e   : > { %s5297_s28 = scalar_lea.hbm %s5351_s6, %s3773_s17  ;;  %s4539_s11 = sshll.u32 %s4625_s24, 4  ;;  %s4540_s11 = int_to_ptr.vmem [resolvable:$false] %s4539_s11 }
0x113f   : > { %p4542_p1 = scmp.lt.s32.totalorder %s5299_s19, %s4540_s11 }
0x11ad   : > { %v3376_v7 = vpop.xlane.xlu1 %3375 }
0x11ae   : > { %4533 = vrcp.f32 %v3376_v7 }
0x11b1   : > { %v2231_v5 = vpop.permute.xlu1 %2230 }
0x11b2   : > { %2234 = vst.msk [vmem:[#allocation4] sm:$0xff] %vm2233_vm5, %v2231_v5 }
0x11b5   : > { %v2476_v8 = vpop.permute.xlu1 %2475 }
0x11b6   : > { %2479 = vst.msk [vmem:[#allocation4] sm:$0xff] %vm2478_vm6, %v2476_v8 }
0x11b8   : > { %v4534_v9 = vpop.eup %4533 }
0x11b9   : > { %v3378_v31 = vmul.f32 %v4534_v9, %v4532_v6  ;;  %v2721_v11 = vpop.permute.xlu1 %2720 }
0x11ba   : > { %2724 = vst.msk [vmem:[#allocation4] sm:$0xff] %vm2723_vm7, %v2721_v11 }
0x11bb   : > { %4275 = vmatmul.mubr.msk.f32.vlgmr.msra.gmra.mrb[46].mxu1 %vm1658_vm3, %v3378_v31  ;;  %2969 = vst.msk [vmem:[#allocation4] sm:$0xff] %vm2968_vm8, %v2966_v12 }
0x11bd   : > { %v3211_v54 = vpop.permute.xlu1 %3210 }
0x11be   : > { %3214 = vst.msk [vmem:[#allocation4] sm:$0xff] %vm3213_vm9, %v3211_v54 }
0x128e   : > { %v3450_v19 = vpop.f32.mrb[46].mxu1 }
0x128f   : > { %3455 = vrot.lane.b32.xlu0 %v3450_v19, %s4624_s12  ;;  %v4276_v20 = vpop.f32.mrb[47].mxu1  ;;  %s4541_s12 = scalar_lea.vmem %s4540_s11, 256 }
0x1290   : > { %p4543_p2 = scmp.lt.s32.totalorder %s4541_s12, %s4535_s8 }
0x1292   : > { %p4544_p3 = por %p4543_p2, %p4542_p1 }
0x1294   : > { %p4545_p5 = pnand %p4544_p3, %p4538_p0 }
0x1301   : > { %v3456_v21 = vpop.permute.xlu0 %3455 }
0x1302   : > { %3459 = vst.msk [vmem:[#allocation4] sm:$0xff] %vm3458_vm10, %v3456_v21 }
0x1309   : > { %v3460_v22 = vld [vmem:[#allocation4] sm:$0xff] }
0x130a   : > { %4286 = vmatmul.mubr.msk.f32.vlgmr.msra.gmra.mrb[32].mxu0 %vm270_vm1, %v3460_v22 }
0x13dd   : > { %v3541_v3 = vpop.f32.mrb[32].mxu0 }
0x13de   : > { %v3542_v24 = vadd.f32 %v3770_v23, %v3541_v3  ;;  %v4287_v25 = vpop.f32.mrb[33].mxu0 }
0x13e0   : > { %3545 = vst.msk [vmem:[%s256_s18] sm:$0xff] %vm270_vm1, %v3542_v24 }
0x13e1   : > { %4548 = shalt.err (!%p4545_p5)
}
0x13e2   : > { %s4549_s13 = scalar_lea.hbm %s5297_s28, 128  ;;  %s4553_s16 = scalar_lea.hbm %s5351_s6, 256 }
0x13e3   : > { %p4550_p6 = scmp.ne.s32.totalorder %s5297_s28, %s4549_s13  ;;  %p4554_p10 = scmp.lt.u32.totalorder %s5297_s28, %s5351_s6 }
0x13e4   : > { %p4555_p11 = scmp.lt.u32.totalorder %s4553_s16, %s4549_s13  ;;  %p4557_p13 = scmp.lt.u32.totalorder %s4549_s13, %s5297_s28 }
0x13e5   : > { %p4551_p7 = pnand %p4550_p6, %p4701_p4 }
0x13e6   : > { %p4556_p12 = por %p4555_p11, %p4554_p10 }
0x13e7   : > { %p4552_p9 = pneg %p4551_p7 }
0x13e8   : > { %p4558_p0 = por %p4557_p13, %p4556_p12 }
0x13ea   : > { %p4559_p1 = pnand %p4558_p0, %p4552_p9 }
0x13ec   : > { %4562 = shalt.err (!%p4559_p1)
}
0x13ed   : > { %4438 = dma.vmem_to_hbm [thread:$0]  (%p4701_p4), %s5299_s19, 128, %s5297_s28, %s3547_s30  }
0x13ee PF: > { %p4444_p2 = scmp.ge.s32.totalorder %s4613_s26, 2  ;;  %s3573_s20 = sand.u32 1, %s4593_s21  }
0x13ef   : > { %s3574_s27 = scalar_lea.sflag [#allocation6], %s3573_s20 }
0x13f0   : > { %p4441_p3 = pnand %p4444_p2, %p4708_p8 }
0x13f2   : > { %4588 = dma.done.wait (!%p4441_p3), %s3574_s27, 128  }
0x13f3   : > { %4590 = vsyncadd (!%p4441_p3), %s3574_s27, 4294967168  ;;  %s19_s26 = sadd.s32 1, %s4613_s26   ;;  %s5354_s21 = smov %s4597_s22 }
0x13f4   : > { %p16_p5 = scmp.ge.s32.totalorder %s19_s26, 4   ;;  %s5355_s22 = smov %s4601_s23 }
0x13f5   : > { %s5356_s23 = smov %s4714_s10  ;;  %s5357_s24 = smov %s4609_s25 }
0x13f6   : > { %s5358_s25 = smov %s5360_s29  ;;  %18 = sbr.rel (!%p16_p5) target bundleno = 4 (0x4), region = 133 }
0x13fd   :  { %3579 = vsyncpa [#allocation6], 1 }
0x13fe   :  { %3581 = vsyncpa [#allocation6 + $0x1], 1 }

</bundles_post_ra>
